<compile_context>
chip_gen: v7x
topology: tpu7x:2x2x1
jax: 0.10.0
libtpu: 0.0.40
codegen_flags: <defaults>
</compile_context>

<pallas_src>
import jax
import jax.numpy as jnp
from jax.experimental import pallas as pl
from jax.experimental.pallas import tpu as pltpu

_EPS = 1e-5


def _sigmoid(v):
    # Single EUP push (tanh) instead of exp + reciprocal.
    return 0.5 * (jnp.tanh(0.5 * v) + 1.0)


def make_conv_module_kernel(Bb, T, D, C, K):
    """Kernel for one grid step (Bb batch rows) of _ConvolutionModule.forward.

    Refs (in order): x:(Bb,T,D) f32, vec_d:(3,D) f32 [ln_w, ln_b, pw2_b],
    pw1_w:(D,2C) bf16, pw1_b:(1,2C) f32, dw_w:(K,C) f32,
    vec_c:(3,C) f32 [dw_b, gn_w, gn_b], pw2_w:(C,D) bf16, out:(Bb,T,D) f32.
    """
    pad = (K - 1) // 2
    rows = Bb * T

    def depthwise_same(hb, dw_w):
        # hb: (T, C) f32; dw_w: (K, C) f32.  out[t] = sum_k dw_w[k] * hb[t + k - pad], zero-padded.
        acc = jnp.zeros((T, C), jnp.float32)
        for k in range(K):                                            # K small & static
            shifted = pltpu.roll(hb, shift=(pad - k) % T, axis=0)     # shifted[t] = hb[(t+k-pad) % T]
            acc = acc + shifted * dw_w[k:k + 1, :]
        if pad == 0:
            return acc
        # Remove the wrapped-around contributions on the first/last `pad` rows (<= 2*pad rows)
        # instead of masking every tap over the full (T, C) slab.
        zero_row = jnp.zeros((1, C), jnp.float32)
        top = []
        for t in range(pad):                  # rows 0..pad-1 pulled from the tail of hb
            corr = zero_row
            for k in range(pad - t):
                src = T - pad + t + k
                corr = corr + dw_w[k:k + 1, :] * hb[src:src + 1, :]
            top.append(corr)
        bot = []
        for s in range(pad):                  # rows T-pad..T-1 pulled from the head of hb
            corr = zero_row
            for k in range(2 * pad - s, K):
                src = k + s - 2 * pad
                corr = corr + dw_w[k:k + 1, :] * hb[src:src + 1, :]
            bot.append(corr)
        mid = jnp.zeros((T - 2 * pad, C), jnp.float32)
        corr_full = jnp.concatenate(top + [mid] + bot, axis=0)        # (T, C), one subtract total
        return acc - corr_full

    def kernel(x_ref, vec_d_ref, pw1_w_ref, pw1_b_ref, dw_w_ref, vec_c_ref,
               pw2_w_ref, o_ref):
        vec_d = vec_d_ref[...]                               # (3, D); static row slices are free
        ln_w, ln_b, pw2_b = vec_d[0:1, :], vec_d[1:2, :], vec_d[2:3, :]
        vec_c = vec_c_ref[...]                               # (3, C)
        dw_b, gn_w, gn_b = vec_c[0:1, :], vec_c[1:2, :], vec_c[2:3, :]
        dw_w = dw_w_ref[...]                                 # (K, C)

        # Flatten batch*time for LN + matmuls (layout-free: T is a multiple of 8).
        x = x_ref[...].reshape(rows, D)                      # (Bb*T, D) f32

        # ---- LayerNorm over channels (one-pass stats: var = E[x^2] - mu^2) --------------
        mu = jnp.mean(x, axis=-1, keepdims=True)
        ms = jnp.mean(x * x, axis=-1, keepdims=True)
        h = (x - mu) * jax.lax.rsqrt(ms - mu * mu + _EPS) * ln_w + ln_b

        # ---- pointwise Conv1d(D -> 2C, k=1) == matmul (bf16 MXU, fp32 accumulate) -------
        h = jnp.dot(h.astype(jnp.bfloat16), pw1_w_ref[...],
                    preferred_element_type=jnp.float32) + pw1_b_ref[...]   # (Bb*T, 2C)

        # ---- GLU over the channel axis ---------------------------------------------------
        h = h[:, :C] * _sigmoid(h[:, C:])                    # (Bb*T, C) f32

        # ---- per-sample depthwise conv + GroupNorm(1 group) + SiLU (Bb small & static) ---
        ys = []
        for b in range(Bb):
            hb = h[b * T:(b + 1) * T, :]                     # (T, C), sublane-aligned slice
            hb = depthwise_same(hb, dw_w) + dw_b
            # GroupNorm stats over all (T, C) of this sample (one-pass, exact mean-of-means).
            mu_b = jnp.mean(jnp.mean(hb, axis=1, keepdims=True), axis=0, keepdims=True)
            ms_b = jnp.mean(jnp.mean(hb * hb, axis=1, keepdims=True), axis=0, keepdims=True)
            hb = (hb - mu_b) * jax.lax.rsqrt(ms_b - mu_b * mu_b + _EPS) * gn_w + gn_b
            ys.append(hb * _sigmoid(hb))                     # SiLU
        y = jnp.concatenate(ys, axis=0) if Bb > 1 else ys[0]  # (Bb*T, C)

        # ---- pointwise Conv1d(C -> D, k=1) == matmul (bf16 MXU, fp32 accumulate) ---------
        y = jnp.dot(y.astype(jnp.bfloat16), pw2_w_ref[...],
                    preferred_element_type=jnp.float32) + pw2_b

        # TODO(synk): torch.nn.Dropout is identity here (p=0.0 / inference semantics).
        o_ref[...] = y.reshape(Bb, T, D)

    return kernel


def _choose_batch_block(B, T, max_bb=8):
    """Smallest divisor of B whose flattened row count Bb*T reaches ~256 (fills the MXU and
    amortizes per-step overhead), capped to bound the static per-sample unroll."""
    best = 1
    for d in range(1, B + 1):
        if B % d or d > max_bb:
            continue
        best = d
        if d * T >= 256:
            break
    return best


def _vmem_limit_bytes(Bb, T, D, C, K):
    # Resident weights (double-buffered by the pipeline) + per-step activation slabs.
    weights = 2 * (2 * (D * 2 * C + C * D) + 4 * (3 * D + 2 * C + (K + 3) * C))
    rows = Bb * T
    acts = 2 * 2 * 4 * rows * D + 12 * 4 * rows * max(2 * C, D)
    need = weights + acts + (4 << 20)
    try:
        cap = pltpu.get_tpu_info().vmem_capacity_bytes     # 64 MiB on v7x, 128 MiB on v5e/v6e
    except Exception:                                      # conservative fallback
        cap = 64 << 20
    return int(min(max(need, 16 << 20), (cap * 3) // 4))   # ~48 MiB on v7x, ~96 MiB on v5e/v6e


def conv_module_forward(x, params):
    """x: (B, T, D) float32.  Returns (B, T, D) float32 (matches module.forward)."""
    B, T, D = x.shape
    C = params["pw2_w"].shape[0]
    K = params["dw_w"].shape[0]
    assert (K - 1) % 2 == 0, "depthwise_kernel_size must be odd"
    assert T >= K, "kernel assumes T >= depthwise_kernel_size"
    assert T % 8 == 0, "keep T a multiple of 8 so reshapes/rolls stay sublane-aligned"

    Bb = _choose_batch_block(B, T)

    # Pack the small per-channel vectors into two stacked arrays (fewer DMA streams / fewer
    # (8,128)-padded VMEM buffers per grid step).
    vec_d = jnp.stack([params["ln_w"], params["ln_b"], params["pw2_b"]], axis=0)  # (3, D)
    vec_c = jnp.stack([params["dw_b"], params["gn_w"], params["gn_b"]], axis=0)   # (3, C)
    pw1_b = params["pw1_b"][None, :]                                              # (1, 2C)
    # Large matmul weights travel and sit in VMEM as bf16 (MXU-native, half the bytes).
    pw1_w = params["pw1_w"].astype(jnp.bfloat16)                                  # (D, 2C)
    pw2_w = params["pw2_w"].astype(jnp.bfloat16)                                  # (C, D)
    dw_w = params["dw_w"]                                                         # (K, C) f32

    kernel = make_conv_module_kernel(Bb, T, D, C, K)

    resident = lambda i: (0, 0)   # constant block index -> fetched once, stays resident
    in_specs = [
        pl.BlockSpec((Bb, T, D), lambda i: (i, 0, 0)),   # Bb batch rows per grid step
        pl.BlockSpec(vec_d.shape, resident),
        pl.BlockSpec(pw1_w.shape, resident),
        pl.BlockSpec(pw1_b.shape, resident),
        pl.BlockSpec(dw_w.shape, resident),
        pl.BlockSpec(vec_c.shape, resident),
        pl.BlockSpec(pw2_w.shape, resident),
    ]
    # TODO(synk): on v7x add pipeline_mode=pl.Buffered(1) to the six resident specs (drops their
    # redundant second pipeline buffer on the 64 MiB part), and at production T add a time-tile
    # grid axis (halo rows for the depthwise conv + two-pass GroupNorm stats) so parallel work
    # becomes B * T_tiles and the per-step working set stays bounded.
    out_specs = pl.BlockSpec((Bb, T, D), lambda i: (i, 0, 0))

    return pl.pallas_call(
        kernel,
        out_shape=jax.ShapeDtypeStruct((B, T, D), jnp.float32),
        grid=(B // Bb,),
        in_specs=in_specs,
        out_specs=out_specs,
        compiler_params=pltpu.CompilerParams(
            dimension_semantics=("parallel",),               # batch blocks across TCs on v7x
            vmem_limit_bytes=_vmem_limit_bytes(Bb, T, D, C, K),
        ),
    )(x, vec_d, pw1_w, pw1_b, dw_w, vec_c, pw2_w)


def conv_module_reference(x, params):
    """Pure-JAX fp32 reference of _ConvolutionModule.forward (GroupNorm path, dropout=0)."""
    C = params["pw2_w"].shape[0]
    K = params["dw_w"].shape[0]
    pad = (K - 1) // 2
    T = x.shape[1]

    mu = x.mean(-1, keepdims=True)
    var = ((x - mu) ** 2).mean(-1, keepdims=True)
    h = (x - mu) * jax.lax.rsqrt(var + _EPS) * params["ln_w"] + params["ln_b"]
    h = h @ params["pw1_w"] + params["pw1_b"]
    h = h[..., :C] * jax.nn.sigmoid(h[..., C:])
    hp = jnp.pad(h, ((0, 0), (pad, pad), (0, 0)))
    h = sum(hp[:, k:k + T, :] * params["dw_w"][k][None, None, :] for k in range(K))
    h = h + params["dw_b"]
    mu = h.mean(axis=(1, 2), keepdims=True)
    var = ((h - mu) ** 2).mean(axis=(1, 2), keepdims=True)
    h = (h - mu) * jax.lax.rsqrt(var + _EPS) * params["gn_w"] + params["gn_b"]
    h = h * jax.nn.sigmoid(h)
    return h @ params["pw2_w"] + params["pw2_b"]


def init_params(key, D, C, K):
    ks = jax.random.split(key, 6)

    def w(k, shape, scale=0.05):
        return scale * jax.random.normal(k, shape, jnp.float32)

    return {
        # LayerNorm(input_dim)
        "ln_w": jnp.ones((D,), jnp.float32),
        "ln_b": jnp.zeros((D,), jnp.float32),
        # Conv1d(D, 2C, 1): weight (2C, D, 1) stored pre-transposed as (D, 2C)
        "pw1_w": w(ks[0], (D, 2 * C)),
        "pw1_b": w(ks[1], (2 * C,)),
        # depthwise Conv1d(C, C, K, groups=C): weight (C, 1, K) stored as (K, C)
        "dw_w": w(ks[2], (K, C)),
        "dw_b": w(ks[3], (C,)),
        # GroupNorm(num_groups=1, num_channels=C)
        "gn_w": jnp.ones((C,), jnp.float32),
        "gn_b": jnp.zeros((C,), jnp.float32),
        # Conv1d(C, D, 1): weight (D, C, 1) stored pre-transposed as (C, D)
        "pw2_w": w(ks[4], (C, D)),
        "pw2_b": w(ks[5], (D,)),
    }


if __name__ == "__main__":
    # Small but lane-dense config: D, C multiples of 128 (full-lane vst), T a multiple of 8.
    B, T, D, C, K = 2, 16, 128, 128, 7

    key = jax.random.PRNGKey(0)
    kx, kp = jax.random.split(key)
    x = jax.random.normal(kx, (B, T, D), jnp.float32)
    params = init_params(kp, D, C, K)

    out = jax.jit(conv_module_forward)(x, params)
    out = jax.block_until_ready(out)

    assert out.shape == (B, T, D), out.shape
    assert bool(jnp.all(jnp.isfinite(out))), "non-finite output"
    ref = conv_module_reference(x, params)
    max_err = float(jnp.max(jnp.abs(out - ref)))
    assert bool(jnp.allclose(out, ref, atol=5e-2, rtol=5e-2)), f"mismatch, max_err={max_err}"
    print("KERNEL_OK")
</pallas_src>

<mosaic_0001>
module attributes {stable_mosaic.version = 11 : i64} {
  func.func @kernel(%arg0: i32, %arg1: memref<2x16x128xf32, #tpu.memory_space<vmem>>, %arg2: memref<3x128xf32, #tpu.memory_space<vmem>>, %arg3: memref<128x256xbf16, #tpu.memory_space<vmem>>, %arg4: memref<1x256xf32, #tpu.memory_space<vmem>>, %arg5: memref<7x128xf32, #tpu.memory_space<vmem>>, %arg6: memref<3x128xf32, #tpu.memory_space<vmem>>, %arg7: memref<128x128xbf16, #tpu.memory_space<vmem>>, %arg8: memref<2x16x128xf32, #tpu.memory_space<vmem>>) attributes {dimension_semantics = [#tpu.dimension_semantics<parallel>], iteration_bounds = array<i64: 1>, scalar_prefetch = 0 : i64, scratch_operands = 0 : i64, tpu.core_type = #tpu.core_type<tc>, window_params = [{transform_indices = @transform_0, window_bounds = array<i64: 2, 16, 128>}, {pipeline_mode = #tpu.pipeline_mode<synchronous>, transform_indices = @transform_1, window_bounds = array<i64: 3, 128>}, {pipeline_mode = #tpu.pipeline_mode<synchronous>, transform_indices = @transform_2, window_bounds = array<i64: 128, 256>}, {pipeline_mode = #tpu.pipeline_mode<synchronous>, transform_indices = @transform_3, window_bounds = array<i64: 1, 256>}, {pipeline_mode = #tpu.pipeline_mode<synchronous>, transform_indices = @transform_4, window_bounds = array<i64: 7, 128>}, {pipeline_mode = #tpu.pipeline_mode<synchronous>, transform_indices = @transform_5, window_bounds = array<i64: 3, 128>}, {pipeline_mode = #tpu.pipeline_mode<synchronous>, transform_indices = @transform_6, window_bounds = array<i64: 128, 128>}, {transform_indices = @transform_7, window_bounds = array<i64: 2, 16, 128>}]} {
    %c0 = arith.constant 0 : index
    %c0_0 = arith.constant 0 : index
    %0 = vector.load %arg2[%c0, %c0_0] : memref<3x128xf32, #tpu.memory_space<vmem>>, vector<3x128xf32>
    %1 = vector.extract_strided_slice %0 {offsets = [0, 0], sizes = [1, 128], strides = [1, 1]} : vector<3x128xf32> to vector<1x128xf32>
    %2 = vector.extract_strided_slice %0 {offsets = [1, 0], sizes = [1, 128], strides = [1, 1]} : vector<3x128xf32> to vector<1x128xf32>
    %3 = vector.extract_strided_slice %0 {offsets = [2, 0], sizes = [1, 128], strides = [1, 1]} : vector<3x128xf32> to vector<1x128xf32>
    %c0_1 = arith.constant 0 : index
    %c0_2 = arith.constant 0 : index
    %4 = vector.load %arg6[%c0_1, %c0_2] : memref<3x128xf32, #tpu.memory_space<vmem>>, vector<3x128xf32>
    %5 = vector.extract_strided_slice %4 {offsets = [0, 0], sizes = [1, 128], strides = [1, 1]} : vector<3x128xf32> to vector<1x128xf32>
    %6 = vector.extract_strided_slice %4 {offsets = [1, 0], sizes = [1, 128], strides = [1, 1]} : vector<3x128xf32> to vector<1x128xf32>
    %7 = vector.extract_strided_slice %4 {offsets = [2, 0], sizes = [1, 128], strides = [1, 1]} : vector<3x128xf32> to vector<1x128xf32>
    %c0_3 = arith.constant 0 : index
    %c0_4 = arith.constant 0 : index
    %8 = vector.load %arg5[%c0_3, %c0_4] : memref<7x128xf32, #tpu.memory_space<vmem>>, vector<7x128xf32>
    %c0_5 = arith.constant 0 : index
    %c0_6 = arith.constant 0 : index
    %c0_7 = arith.constant 0 : index
    %9 = vector.load %arg1[%c0_5, %c0_6, %c0_7] : memref<2x16x128xf32, #tpu.memory_space<vmem>>, vector<2x16x128xf32>
    %10 = vector.shape_cast %9 : vector<2x16x128xf32> to vector<32x128xf32>
    %cst = arith.constant dense<0.000000e+00> : vector<32xf32>
    %11 = vector.multi_reduction <add>, %10, %cst [1] : vector<32x128xf32> to vector<32xf32>
    %12 = vector.shape_cast %11 : vector<32xf32> to vector<32x1xf32>
    %cst_8 = arith.constant 1.280000e+02 : f32
    %13 = vector.broadcast %cst_8 : f32 to vector<32x1xf32>
    %14 = arith.divf %12, %13 : vector<32x1xf32>
    %15 = arith.mulf %10, %10 : vector<32x128xf32>
    %cst_9 = arith.constant dense<0.000000e+00> : vector<32xf32>
    %16 = vector.multi_reduction <add>, %15, %cst_9 [1] : vector<32x128xf32> to vector<32xf32>
    %17 = vector.shape_cast %16 : vector<32xf32> to vector<32x1xf32>
    %cst_10 = arith.constant 1.280000e+02 : f32
    %18 = vector.broadcast %cst_10 : f32 to vector<32x1xf32>
    %19 = arith.divf %17, %18 : vector<32x1xf32>
    %20 = vector.broadcast %14 : vector<32x1xf32> to vector<32x128xf32>
    %21 = arith.subf %10, %20 : vector<32x128xf32>
    %22 = arith.mulf %14, %14 : vector<32x1xf32>
    %23 = arith.subf %19, %22 : vector<32x1xf32>
    %cst_11 = arith.constant 9.99999974E-6 : f32
    %24 = vector.broadcast %cst_11 : f32 to vector<32x1xf32>
    %25 = arith.addf %23, %24 : vector<32x1xf32>
    %26 = math.rsqrt %25 : vector<32x1xf32>
    %27 = vector.broadcast %26 : vector<32x1xf32> to vector<32x128xf32>
    %28 = arith.mulf %21, %27 : vector<32x128xf32>
    %29 = vector.broadcast %1 : vector<1x128xf32> to vector<32x128xf32>
    %30 = arith.mulf %28, %29 : vector<32x128xf32>
    %31 = vector.broadcast %2 : vector<1x128xf32> to vector<32x128xf32>
    %32 = arith.addf %30, %31 : vector<32x128xf32>
    %33 = arith.truncf %32 : vector<32x128xf32> to vector<32x128xbf16>
    %c0_12 = arith.constant 0 : index
    %c0_13 = arith.constant 0 : index
    %34 = vector.load %arg3[%c0_12, %c0_13] : memref<128x256xbf16, #tpu.memory_space<vmem>>, vector<128x256xbf16>
    %cst_14 = arith.constant dense<0.000000e+00> : vector<32x256xf32>
    %35 = tpu.matmul %33, %34, %cst_14 {dimension_numbers = #tpu.dot_dimension_numbers<[1], [0], [0], [1], [0, 0, 1, 1], [], []>} : vector<32x128xbf16>, vector<128x256xbf16>, vector<32x256xf32> -> vector<32x256xf32>
    %c0_15 = arith.constant 0 : index
    %c0_16 = arith.constant 0 : index
    %36 = vector.load %arg4[%c0_15, %c0_16] : memref<1x256xf32, #tpu.memory_space<vmem>>, vector<1x256xf32>
    %37 = vector.broadcast %36 : vector<1x256xf32> to vector<32x256xf32>
    %38 = arith.addf %35, %37 : vector<32x256xf32>
    %39 = vector.extract_strided_slice %38 {offsets = [0, 0], sizes = [32, 128], strides = [1, 1]} : vector<32x256xf32> to vector<32x128xf32>
    %40 = vector.extract_strided_slice %38 {offsets = [0, 128], sizes = [32, 128], strides = [1, 1]} : vector<32x256xf32> to vector<32x128xf32>
    %cst_17 = arith.constant 5.000000e-01 : f32
    %41 = vector.broadcast %cst_17 : f32 to vector<32x128xf32>
    %42 = arith.mulf %41, %40 : vector<32x128xf32>
    %43 = math.tanh %42 : vector<32x128xf32>
    %cst_18 = arith.constant 1.000000e+00 : f32
    %44 = vector.broadcast %cst_18 : f32 to vector<32x128xf32>
    %45 = arith.addf %43, %44 : vector<32x128xf32>
    %cst_19 = arith.constant 5.000000e-01 : f32
    %46 = vector.broadcast %cst_19 : f32 to vector<32x128xf32>
    %47 = arith.mulf %46, %45 : vector<32x128xf32>
    %48 = arith.mulf %39, %47 : vector<32x128xf32>
    %49 = vector.extract_strided_slice %48 {offsets = [0, 0], sizes = [16, 128], strides = [1, 1]} : vector<32x128xf32> to vector<16x128xf32>
    %cst_20 = arith.constant 0.000000e+00 : f32
    %50 = vector.broadcast %cst_20 : f32 to vector<16x128xf32>
    %c3_i32 = arith.constant 3 : i32
    %51 = tpu.dynamic_rotate %49 by %c3_i32 dim 0 : vector<16x128xf32>, i32 -> vector<16x128xf32>
    %52 = vector.extract_strided_slice %8 {offsets = [0, 0], sizes = [1, 128], strides = [1, 1]} : vector<7x128xf32> to vector<1x128xf32>
    %53 = vector.broadcast %52 : vector<1x128xf32> to vector<16x128xf32>
    %54 = arith.mulf %51, %53 : vector<16x128xf32>
    %55 = arith.addf %50, %54 : vector<16x128xf32>
    %c2_i32 = arith.constant 2 : i32
    %56 = tpu.dynamic_rotate %49 by %c2_i32 dim 0 : vector<16x128xf32>, i32 -> vector<16x128xf32>
    %57 = vector.extract_strided_slice %8 {offsets = [1, 0], sizes = [1, 128], strides = [1, 1]} : vector<7x128xf32> to vector<1x128xf32>
    %58 = vector.broadcast %57 : vector<1x128xf32> to vector<16x128xf32>
    %59 = arith.mulf %56, %58 : vector<16x128xf32>
    %60 = arith.addf %55, %59 : vector<16x128xf32>
    %c1_i32 = arith.constant 1 : i32
    %61 = tpu.dynamic_rotate %49 by %c1_i32 dim 0 : vector<16x128xf32>, i32 -> vector<16x128xf32>
    %62 = vector.extract_strided_slice %8 {offsets = [2, 0], sizes = [1, 128], strides = [1, 1]} : vector<7x128xf32> to vector<1x128xf32>
    %63 = vector.broadcast %62 : vector<1x128xf32> to vector<16x128xf32>
    %64 = arith.mulf %61, %63 : vector<16x128xf32>
    %65 = arith.addf %60, %64 : vector<16x128xf32>
    %c0_i32 = arith.constant 0 : i32
    %66 = tpu.dynamic_rotate %49 by %c0_i32 dim 0 : vector<16x128xf32>, i32 -> vector<16x128xf32>
    %67 = vector.extract_strided_slice %8 {offsets = [3, 0], sizes = [1, 128], strides = [1, 1]} : vector<7x128xf32> to vector<1x128xf32>
    %68 = vector.broadcast %67 : vector<1x128xf32> to vector<16x128xf32>
    %69 = arith.mulf %66, %68 : vector<16x128xf32>
    %70 = arith.addf %65, %69 : vector<16x128xf32>
    %c15_i32 = arith.constant 15 : i32
    %71 = tpu.dynamic_rotate %49 by %c15_i32 dim 0 : vector<16x128xf32>, i32 -> vector<16x128xf32>
    %72 = vector.extract_strided_slice %8 {offsets = [4, 0], sizes = [1, 128], strides = [1, 1]} : vector<7x128xf32> to vector<1x128xf32>
    %73 = vector.broadcast %72 : vector<1x128xf32> to vector<16x128xf32>
    %74 = arith.mulf %71, %73 : vector<16x128xf32>
    %75 = arith.addf %70, %74 : vector<16x128xf32>
    %c14_i32 = arith.constant 14 : i32
    %76 = tpu.dynamic_rotate %49 by %c14_i32 dim 0 : vector<16x128xf32>, i32 -> vector<16x128xf32>
    %77 = vector.extract_strided_slice %8 {offsets = [5, 0], sizes = [1, 128], strides = [1, 1]} : vector<7x128xf32> to vector<1x128xf32>
    %78 = vector.broadcast %77 : vector<1x128xf32> to vector<16x128xf32>
    %79 = arith.mulf %76, %78 : vector<16x128xf32>
    %80 = arith.addf %75, %79 : vector<16x128xf32>
    %c13_i32 = arith.constant 13 : i32
    %81 = tpu.dynamic_rotate %49 by %c13_i32 dim 0 : vector<16x128xf32>, i32 -> vector<16x128xf32>
    %82 = vector.extract_strided_slice %8 {offsets = [6, 0], sizes = [1, 128], strides = [1, 1]} : vector<7x128xf32> to vector<1x128xf32>
    %83 = vector.broadcast %82 : vector<1x128xf32> to vector<16x128xf32>
    %84 = arith.mulf %81, %83 : vector<16x128xf32>
    %85 = arith.addf %80, %84 : vector<16x128xf32>
    %cst_21 = arith.constant 0.000000e+00 : f32
    %86 = vector.broadcast %cst_21 : f32 to vector<1x128xf32>
    %87 = vector.extract_strided_slice %8 {offsets = [0, 0], sizes = [1, 128], strides = [1, 1]} : vector<7x128xf32> to vector<1x128xf32>
    %88 = vector.extract_strided_slice %49 {offsets = [13, 0], sizes = [1, 128], strides = [1, 1]} : vector<16x128xf32> to vector<1x128xf32>
    %89 = arith.mulf %87, %88 : vector<1x128xf32>
    %90 = arith.addf %86, %89 : vector<1x128xf32>
    %91 = vector.extract_strided_slice %8 {offsets = [1, 0], sizes = [1, 128], strides = [1, 1]} : vector<7x128xf32> to vector<1x128xf32>
    %92 = vector.extract_strided_slice %49 {offsets = [14, 0], sizes = [1, 128], strides = [1, 1]} : vector<16x128xf32> to vector<1x128xf32>
    %93 = arith.mulf %91, %92 : vector<1x128xf32>
    %94 = arith.addf %90, %93 : vector<1x128xf32>
    %95 = vector.extract_strided_slice %8 {offsets = [2, 0], sizes = [1, 128], strides = [1, 1]} : vector<7x128xf32> to vector<1x128xf32>
    %96 = vector.extract_strided_slice %49 {offsets = [15, 0], sizes = [1, 128], strides = [1, 1]} : vector<16x128xf32> to vector<1x128xf32>
    %97 = arith.mulf %95, %96 : vector<1x128xf32>
    %98 = arith.addf %94, %97 : vector<1x128xf32>
    %99 = vector.extract_strided_slice %8 {offsets = [0, 0], sizes = [1, 128], strides = [1, 1]} : vector<7x128xf32> to vector<1x128xf32>
    %100 = vector.extract_strided_slice %49 {offsets = [14, 0], sizes = [1, 128], strides = [1, 1]} : vector<16x128xf32> to vector<1x128xf32>
    %101 = arith.mulf %99, %100 : vector<1x128xf32>
    %102 = arith.addf %86, %101 : vector<1x128xf32>
    %103 = vector.extract_strided_slice %8 {offsets = [1, 0], sizes = [1, 128], strides = [1, 1]} : vector<7x128xf32> to vector<1x128xf32>
    %104 = vector.extract_strided_slice %49 {offsets = [15, 0], sizes = [1, 128], strides = [1, 1]} : vector<16x128xf32> to vector<1x128xf32>
    %105 = arith.mulf %103, %104 : vector<1x128xf32>
    %106 = arith.addf %102, %105 : vector<1x128xf32>
    %107 = vector.extract_strided_slice %8 {offsets = [0, 0], sizes = [1, 128], strides = [1, 1]} : vector<7x128xf32> to vector<1x128xf32>
    %108 = vector.extract_strided_slice %49 {offsets = [15, 0], sizes = [1, 128], strides = [1, 1]} : vector<16x128xf32> to vector<1x128xf32>
    %109 = arith.mulf %107, %108 : vector<1x128xf32>
    %110 = arith.addf %86, %109 : vector<1x128xf32>
    %111 = vector.extract_strided_slice %8 {offsets = [6, 0], sizes = [1, 128], strides = [1, 1]} : vector<7x128xf32> to vector<1x128xf32>
    %112 = vector.extract_strided_slice %49 {offsets = [0, 0], sizes = [1, 128], strides = [1, 1]} : vector<16x128xf32> to vector<1x128xf32>
    %113 = arith.mulf %111, %112 : vector<1x128xf32>
    %114 = arith.addf %86, %113 : vector<1x128xf32>
    %115 = vector.extract_strided_slice %8 {offsets = [5, 0], sizes = [1, 128], strides = [1, 1]} : vector<7x128xf32> to vector<1x128xf32>
    %116 = vector.extract_strided_slice %49 {offsets = [0, 0], sizes = [1, 128], strides = [1, 1]} : vector<16x128xf32> to vector<1x128xf32>
    %117 = arith.mulf %115, %116 : vector<1x128xf32>
    %118 = arith.addf %86, %117 : vector<1x128xf32>
    %119 = vector.extract_strided_slice %8 {offsets = [6, 0], sizes = [1, 128], strides = [1, 1]} : vector<7x128xf32> to vector<1x128xf32>
    %120 = vector.extract_strided_slice %49 {offsets = [1, 0], sizes = [1, 128], strides = [1, 1]} : vector<16x128xf32> to vector<1x128xf32>
    %121 = arith.mulf %119, %120 : vector<1x128xf32>
    %122 = arith.addf %118, %121 : vector<1x128xf32>
    %123 = vector.extract_strided_slice %8 {offsets = [4, 0], sizes = [1, 128], strides = [1, 1]} : vector<7x128xf32> to vector<1x128xf32>
    %124 = vector.extract_strided_slice %49 {offsets = [0, 0], sizes = [1, 128], strides = [1, 1]} : vector<16x128xf32> to vector<1x128xf32>
    %125 = arith.mulf %123, %124 : vector<1x128xf32>
    %126 = arith.addf %86, %125 : vector<1x128xf32>
    %127 = vector.extract_strided_slice %8 {offsets = [5, 0], sizes = [1, 128], strides = [1, 1]} : vector<7x128xf32> to vector<1x128xf32>
    %128 = vector.extract_strided_slice %49 {offsets = [1, 0], sizes = [1, 128], strides = [1, 1]} : vector<16x128xf32> to vector<1x128xf32>
    %129 = arith.mulf %127, %128 : vector<1x128xf32>
    %130 = arith.addf %126, %129 : vector<1x128xf32>
    %131 = vector.extract_strided_slice %8 {offsets = [6, 0], sizes = [1, 128], strides = [1, 1]} : vector<7x128xf32> to vector<1x128xf32>
    %132 = vector.extract_strided_slice %49 {offsets = [2, 0], sizes = [1, 128], strides = [1, 1]} : vector<16x128xf32> to vector<1x128xf32>
    %133 = arith.mulf %131, %132 : vector<1x128xf32>
    %134 = arith.addf %130, %133 : vector<1x128xf32>
    %cst_22 = arith.constant 0.000000e+00 : f32
    %135 = vector.broadcast %cst_22 : f32 to vector<10x128xf32>
    %136 = tpu.concatenate %98, %106, %110, %135, %114, %122, %134 in 0 : vector<1x128xf32>, vector<1x128xf32>, vector<1x128xf32>, vector<10x128xf32>, vector<1x128xf32>, vector<1x128xf32>, vector<1x128xf32> -> vector<16x128xf32>
    %137 = arith.subf %85, %136 : vector<16x128xf32>
    %138 = vector.broadcast %5 : vector<1x128xf32> to vector<16x128xf32>
    %139 = arith.addf %137, %138 : vector<16x128xf32>
    %cst_23 = arith.constant dense<0.000000e+00> : vector<16xf32>
    %140 = vector.multi_reduction <add>, %139, %cst_23 [1] : vector<16x128xf32> to vector<16xf32>
    %141 = vector.shape_cast %140 : vector<16xf32> to vector<16x1xf32>
    %cst_24 = arith.constant 1.280000e+02 : f32
    %142 = vector.broadcast %cst_24 : f32 to vector<16x1xf32>
    %143 = arith.divf %141, %142 : vector<16x1xf32>
    %cst_25 = arith.constant dense<0.000000e+00> : vector<1xf32>
    %144 = vector.multi_reduction <add>, %143, %cst_25 [0] : vector<16x1xf32> to vector<1xf32>
    %145 = vector.shape_cast %144 : vector<1xf32> to vector<1x1xf32>
    %cst_26 = arith.constant 1.600000e+01 : f32
    %146 = vector.broadcast %cst_26 : f32 to vector<1x1xf32>
    %147 = arith.divf %145, %146 : vector<1x1xf32>
    %148 = arith.mulf %139, %139 : vector<16x128xf32>
    %cst_27 = arith.constant dense<0.000000e+00> : vector<16xf32>
    %149 = vector.multi_reduction <add>, %148, %cst_27 [1] : vector<16x128xf32> to vector<16xf32>
    %150 = vector.shape_cast %149 : vector<16xf32> to vector<16x1xf32>
    %cst_28 = arith.constant 1.280000e+02 : f32
    %151 = vector.broadcast %cst_28 : f32 to vector<16x1xf32>
    %152 = arith.divf %150, %151 : vector<16x1xf32>
    %cst_29 = arith.constant dense<0.000000e+00> : vector<1xf32>
    %153 = vector.multi_reduction <add>, %152, %cst_29 [0] : vector<16x1xf32> to vector<1xf32>
    %154 = vector.shape_cast %153 : vector<1xf32> to vector<1x1xf32>
    %cst_30 = arith.constant 1.600000e+01 : f32
    %155 = vector.broadcast %cst_30 : f32 to vector<1x1xf32>
    %156 = arith.divf %154, %155 : vector<1x1xf32>
    %157 = vector.broadcast %147 : vector<1x1xf32> to vector<16x128xf32>
    %158 = arith.subf %139, %157 : vector<16x128xf32>
    %159 = arith.mulf %147, %147 : vector<1x1xf32>
    %160 = arith.subf %156, %159 : vector<1x1xf32>
    %cst_31 = arith.constant 9.99999974E-6 : f32
    %161 = vector.broadcast %cst_31 : f32 to vector<1x1xf32>
    %162 = arith.addf %160, %161 : vector<1x1xf32>
    %163 = math.rsqrt %162 : vector<1x1xf32>
    %164 = vector.broadcast %163 : vector<1x1xf32> to vector<16x128xf32>
    %165 = arith.mulf %158, %164 : vector<16x128xf32>
    %166 = vector.broadcast %6 : vector<1x128xf32> to vector<16x128xf32>
    %167 = arith.mulf %165, %166 : vector<16x128xf32>
    %168 = vector.broadcast %7 : vector<1x128xf32> to vector<16x128xf32>
    %169 = arith.addf %167, %168 : vector<16x128xf32>
    %cst_32 = arith.constant 5.000000e-01 : f32
    %170 = vector.broadcast %cst_32 : f32 to vector<16x128xf32>
    %171 = arith.mulf %170, %169 : vector<16x128xf32>
    %172 = math.tanh %171 : vector<16x128xf32>
    %cst_33 = arith.constant 1.000000e+00 : f32
    %173 = vector.broadcast %cst_33 : f32 to vector<16x128xf32>
    %174 = arith.addf %172, %173 : vector<16x128xf32>
    %cst_34 = arith.constant 5.000000e-01 : f32
    %175 = vector.broadcast %cst_34 : f32 to vector<16x128xf32>
    %176 = arith.mulf %175, %174 : vector<16x128xf32>
    %177 = arith.mulf %169, %176 : vector<16x128xf32>
    %178 = vector.extract_strided_slice %48 {offsets = [16, 0], sizes = [16, 128], strides = [1, 1]} : vector<32x128xf32> to vector<16x128xf32>
    %cst_35 = arith.constant 0.000000e+00 : f32
    %179 = vector.broadcast %cst_35 : f32 to vector<16x128xf32>
    %c3_i32_36 = arith.constant 3 : i32
    %180 = tpu.dynamic_rotate %178 by %c3_i32_36 dim 0 : vector<16x128xf32>, i32 -> vector<16x128xf32>
    %181 = vector.extract_strided_slice %8 {offsets = [0, 0], sizes = [1, 128], strides = [1, 1]} : vector<7x128xf32> to vector<1x128xf32>
    %182 = vector.broadcast %181 : vector<1x128xf32> to vector<16x128xf32>
    %183 = arith.mulf %180, %182 : vector<16x128xf32>
    %184 = arith.addf %179, %183 : vector<16x128xf32>
    %c2_i32_37 = arith.constant 2 : i32
    %185 = tpu.dynamic_rotate %178 by %c2_i32_37 dim 0 : vector<16x128xf32>, i32 -> vector<16x128xf32>
    %186 = vector.extract_strided_slice %8 {offsets = [1, 0], sizes = [1, 128], strides = [1, 1]} : vector<7x128xf32> to vector<1x128xf32>
    %187 = vector.broadcast %186 : vector<1x128xf32> to vector<16x128xf32>
    %188 = arith.mulf %185, %187 : vector<16x128xf32>
    %189 = arith.addf %184, %188 : vector<16x128xf32>
    %c1_i32_38 = arith.constant 1 : i32
    %190 = tpu.dynamic_rotate %178 by %c1_i32_38 dim 0 : vector<16x128xf32>, i32 -> vector<16x128xf32>
    %191 = vector.extract_strided_slice %8 {offsets = [2, 0], sizes = [1, 128], strides = [1, 1]} : vector<7x128xf32> to vector<1x128xf32>
    %192 = vector.broadcast %191 : vector<1x128xf32> to vector<16x128xf32>
    %193 = arith.mulf %190, %192 : vector<16x128xf32>
    %194 = arith.addf %189, %193 : vector<16x128xf32>
    %c0_i32_39 = arith.constant 0 : i32
    %195 = tpu.dynamic_rotate %178 by %c0_i32_39 dim 0 : vector<16x128xf32>, i32 -> vector<16x128xf32>
    %196 = vector.extract_strided_slice %8 {offsets = [3, 0], sizes = [1, 128], strides = [1, 1]} : vector<7x128xf32> to vector<1x128xf32>
    %197 = vector.broadcast %196 : vector<1x128xf32> to vector<16x128xf32>
    %198 = arith.mulf %195, %197 : vector<16x128xf32>
    %199 = arith.addf %194, %198 : vector<16x128xf32>
    %c15_i32_40 = arith.constant 15 : i32
    %200 = tpu.dynamic_rotate %178 by %c15_i32_40 dim 0 : vector<16x128xf32>, i32 -> vector<16x128xf32>
    %201 = vector.extract_strided_slice %8 {offsets = [4, 0], sizes = [1, 128], strides = [1, 1]} : vector<7x128xf32> to vector<1x128xf32>
    %202 = vector.broadcast %201 : vector<1x128xf32> to vector<16x128xf32>
    %203 = arith.mulf %200, %202 : vector<16x128xf32>
    %204 = arith.addf %199, %203 : vector<16x128xf32>
    %c14_i32_41 = arith.constant 14 : i32
    %205 = tpu.dynamic_rotate %178 by %c14_i32_41 dim 0 : vector<16x128xf32>, i32 -> vector<16x128xf32>
    %206 = vector.extract_strided_slice %8 {offsets = [5, 0], sizes = [1, 128], strides = [1, 1]} : vector<7x128xf32> to vector<1x128xf32>
    %207 = vector.broadcast %206 : vector<1x128xf32> to vector<16x128xf32>
    %208 = arith.mulf %205, %207 : vector<16x128xf32>
    %209 = arith.addf %204, %208 : vector<16x128xf32>
    %c13_i32_42 = arith.constant 13 : i32
    %210 = tpu.dynamic_rotate %178 by %c13_i32_42 dim 0 : vector<16x128xf32>, i32 -> vector<16x128xf32>
    %211 = vector.extract_strided_slice %8 {offsets = [6, 0], sizes = [1, 128], strides = [1, 1]} : vector<7x128xf32> to vector<1x128xf32>
    %212 = vector.broadcast %211 : vector<1x128xf32> to vector<16x128xf32>
    %213 = arith.mulf %210, %212 : vector<16x128xf32>
    %214 = arith.addf %209, %213 : vector<16x128xf32>
    %cst_43 = arith.constant 0.000000e+00 : f32
    %215 = vector.broadcast %cst_43 : f32 to vector<1x128xf32>
    %216 = vector.extract_strided_slice %8 {offsets = [0, 0], sizes = [1, 128], strides = [1, 1]} : vector<7x128xf32> to vector<1x128xf32>
    %217 = vector.extract_strided_slice %178 {offsets = [13, 0], sizes = [1, 128], strides = [1, 1]} : vector<16x128xf32> to vector<1x128xf32>
    %218 = arith.mulf %216, %217 : vector<1x128xf32>
    %219 = arith.addf %215, %218 : vector<1x128xf32>
    %220 = vector.extract_strided_slice %8 {offsets = [1, 0], sizes = [1, 128], strides = [1, 1]} : vector<7x128xf32> to vector<1x128xf32>
    %221 = vector.extract_strided_slice %178 {offsets = [14, 0], sizes = [1, 128], strides = [1, 1]} : vector<16x128xf32> to vector<1x128xf32>
    %222 = arith.mulf %220, %221 : vector<1x128xf32>
    %223 = arith.addf %219, %222 : vector<1x128xf32>
    %224 = vector.extract_strided_slice %8 {offsets = [2, 0], sizes = [1, 128], strides = [1, 1]} : vector<7x128xf32> to vector<1x128xf32>
    %225 = vector.extract_strided_slice %178 {offsets = [15, 0], sizes = [1, 128], strides = [1, 1]} : vector<16x128xf32> to vector<1x128xf32>
    %226 = arith.mulf %224, %225 : vector<1x128xf32>
    %227 = arith.addf %223, %226 : vector<1x128xf32>
    %228 = vector.extract_strided_slice %8 {offsets = [0, 0], sizes = [1, 128], strides = [1, 1]} : vector<7x128xf32> to vector<1x128xf32>
    %229 = vector.extract_strided_slice %178 {offsets = [14, 0], sizes = [1, 128], strides = [1, 1]} : vector<16x128xf32> to vector<1x128xf32>
    %230 = arith.mulf %228, %229 : vector<1x128xf32>
    %231 = arith.addf %215, %230 : vector<1x128xf32>
    %232 = vector.extract_strided_slice %8 {offsets = [1, 0], sizes = [1, 128], strides = [1, 1]} : vector<7x128xf32> to vector<1x128xf32>
    %233 = vector.extract_strided_slice %178 {offsets = [15, 0], sizes = [1, 128], strides = [1, 1]} : vector<16x128xf32> to vector<1x128xf32>
    %234 = arith.mulf %232, %233 : vector<1x128xf32>
    %235 = arith.addf %231, %234 : vector<1x128xf32>
    %236 = vector.extract_strided_slice %8 {offsets = [0, 0], sizes = [1, 128], strides = [1, 1]} : vector<7x128xf32> to vector<1x128xf32>
    %237 = vector.extract_strided_slice %178 {offsets = [15, 0], sizes = [1, 128], strides = [1, 1]} : vector<16x128xf32> to vector<1x128xf32>
    %238 = arith.mulf %236, %237 : vector<1x128xf32>
    %239 = arith.addf %215, %238 : vector<1x128xf32>
    %240 = vector.extract_strided_slice %8 {offsets = [6, 0], sizes = [1, 128], strides = [1, 1]} : vector<7x128xf32> to vector<1x128xf32>
    %241 = vector.extract_strided_slice %178 {offsets = [0, 0], sizes = [1, 128], strides = [1, 1]} : vector<16x128xf32> to vector<1x128xf32>
    %242 = arith.mulf %240, %241 : vector<1x128xf32>
    %243 = arith.addf %215, %242 : vector<1x128xf32>
    %244 = vector.extract_strided_slice %8 {offsets = [5, 0], sizes = [1, 128], strides = [1, 1]} : vector<7x128xf32> to vector<1x128xf32>
    %245 = vector.extract_strided_slice %178 {offsets = [0, 0], sizes = [1, 128], strides = [1, 1]} : vector<16x128xf32> to vector<1x128xf32>
    %246 = arith.mulf %244, %245 : vector<1x128xf32>
    %247 = arith.addf %215, %246 : vector<1x128xf32>
    %248 = vector.extract_strided_slice %8 {offsets = [6, 0], sizes = [1, 128], strides = [1, 1]} : vector<7x128xf32> to vector<1x128xf32>
    %249 = vector.extract_strided_slice %178 {offsets = [1, 0], sizes = [1, 128], strides = [1, 1]} : vector<16x128xf32> to vector<1x128xf32>
    %250 = arith.mulf %248, %249 : vector<1x128xf32>
    %251 = arith.addf %247, %250 : vector<1x128xf32>
    %252 = vector.extract_strided_slice %8 {offsets = [4, 0], sizes = [1, 128], strides = [1, 1]} : vector<7x128xf32> to vector<1x128xf32>
    %253 = vector.extract_strided_slice %178 {offsets = [0, 0], sizes = [1, 128], strides = [1, 1]} : vector<16x128xf32> to vector<1x128xf32>
    %254 = arith.mulf %252, %253 : vector<1x128xf32>
    %255 = arith.addf %215, %254 : vector<1x128xf32>
    %256 = vector.extract_strided_slice %8 {offsets = [5, 0], sizes = [1, 128], strides = [1, 1]} : vector<7x128xf32> to vector<1x128xf32>
    %257 = vector.extract_strided_slice %178 {offsets = [1, 0], sizes = [1, 128], strides = [1, 1]} : vector<16x128xf32> to vector<1x128xf32>
    %258 = arith.mulf %256, %257 : vector<1x128xf32>
    %259 = arith.addf %255, %258 : vector<1x128xf32>
    %260 = vector.extract_strided_slice %8 {offsets = [6, 0], sizes = [1, 128], strides = [1, 1]} : vector<7x128xf32> to vector<1x128xf32>
    %261 = vector.extract_strided_slice %178 {offsets = [2, 0], sizes = [1, 128], strides = [1, 1]} : vector<16x128xf32> to vector<1x128xf32>
    %262 = arith.mulf %260, %261 : vector<1x128xf32>
    %263 = arith.addf %259, %262 : vector<1x128xf32>
    %cst_44 = arith.constant 0.000000e+00 : f32
    %264 = vector.broadcast %cst_44 : f32 to vector<10x128xf32>
    %265 = tpu.concatenate %227, %235, %239, %264, %243, %251, %263 in 0 : vector<1x128xf32>, vector<1x128xf32>, vector<1x128xf32>, vector<10x128xf32>, vector<1x128xf32>, vector<1x128xf32>, vector<1x128xf32> -> vector<16x128xf32>
    %266 = arith.subf %214, %265 : vector<16x128xf32>
    %267 = vector.broadcast %5 : vector<1x128xf32> to vector<16x128xf32>
    %268 = arith.addf %266, %267 : vector<16x128xf32>
    %cst_45 = arith.constant dense<0.000000e+00> : vector<16xf32>
    %269 = vector.multi_reduction <add>, %268, %cst_45 [1] : vector<16x128xf32> to vector<16xf32>
    %270 = vector.shape_cast %269 : vector<16xf32> to vector<16x1xf32>
    %cst_46 = arith.constant 1.280000e+02 : f32
    %271 = vector.broadcast %cst_46 : f32 to vector<16x1xf32>
    %272 = arith.divf %270, %271 : vector<16x1xf32>
    %cst_47 = arith.constant dense<0.000000e+00> : vector<1xf32>
    %273 = vector.multi_reduction <add>, %272, %cst_47 [0] : vector<16x1xf32> to vector<1xf32>
    %274 = vector.shape_cast %273 : vector<1xf32> to vector<1x1xf32>
    %cst_48 = arith.constant 1.600000e+01 : f32
    %275 = vector.broadcast %cst_48 : f32 to vector<1x1xf32>
    %276 = arith.divf %274, %275 : vector<1x1xf32>
    %277 = arith.mulf %268, %268 : vector<16x128xf32>
    %cst_49 = arith.constant dense<0.000000e+00> : vector<16xf32>
    %278 = vector.multi_reduction <add>, %277, %cst_49 [1] : vector<16x128xf32> to vector<16xf32>
    %279 = vector.shape_cast %278 : vector<16xf32> to vector<16x1xf32>
    %cst_50 = arith.constant 1.280000e+02 : f32
    %280 = vector.broadcast %cst_50 : f32 to vector<16x1xf32>
    %281 = arith.divf %279, %280 : vector<16x1xf32>
    %cst_51 = arith.constant dense<0.000000e+00> : vector<1xf32>
    %282 = vector.multi_reduction <add>, %281, %cst_51 [0] : vector<16x1xf32> to vector<1xf32>
    %283 = vector.shape_cast %282 : vector<1xf32> to vector<1x1xf32>
    %cst_52 = arith.constant 1.600000e+01 : f32
    %284 = vector.broadcast %cst_52 : f32 to vector<1x1xf32>
    %285 = arith.divf %283, %284 : vector<1x1xf32>
    %286 = vector.broadcast %276 : vector<1x1xf32> to vector<16x128xf32>
    %287 = arith.subf %268, %286 : vector<16x128xf32>
    %288 = arith.mulf %276, %276 : vector<1x1xf32>
    %289 = arith.subf %285, %288 : vector<1x1xf32>
    %cst_53 = arith.constant 9.99999974E-6 : f32
    %290 = vector.broadcast %cst_53 : f32 to vector<1x1xf32>
    %291 = arith.addf %289, %290 : vector<1x1xf32>
    %292 = math.rsqrt %291 : vector<1x1xf32>
    %293 = vector.broadcast %292 : vector<1x1xf32> to vector<16x128xf32>
    %294 = arith.mulf %287, %293 : vector<16x128xf32>
    %295 = vector.broadcast %6 : vector<1x128xf32> to vector<16x128xf32>
    %296 = arith.mulf %294, %295 : vector<16x128xf32>
    %297 = vector.broadcast %7 : vector<1x128xf32> to vector<16x128xf32>
    %298 = arith.addf %296, %297 : vector<16x128xf32>
    %cst_54 = arith.constant 5.000000e-01 : f32
    %299 = vector.broadcast %cst_54 : f32 to vector<16x128xf32>
    %300 = arith.mulf %299, %298 : vector<16x128xf32>
    %301 = math.tanh %300 : vector<16x128xf32>
    %cst_55 = arith.constant 1.000000e+00 : f32
    %302 = vector.broadcast %cst_55 : f32 to vector<16x128xf32>
    %303 = arith.addf %301, %302 : vector<16x128xf32>
    %cst_56 = arith.constant 5.000000e-01 : f32
    %304 = vector.broadcast %cst_56 : f32 to vector<16x128xf32>
    %305 = arith.mulf %304, %303 : vector<16x128xf32>
    %306 = arith.mulf %298, %305 : vector<16x128xf32>
    %307 = tpu.concatenate %177, %306 in 0 : vector<16x128xf32>, vector<16x128xf32> -> vector<32x128xf32>
    %308 = arith.truncf %307 : vector<32x128xf32> to vector<32x128xbf16>
    %c0_57 = arith.constant 0 : index
    %c0_58 = arith.constant 0 : index
    %309 = vector.load %arg7[%c0_57, %c0_58] : memref<128x128xbf16, #tpu.memory_space<vmem>>, vector<128x128xbf16>
    %cst_59 = arith.constant dense<0.000000e+00> : vector<32x128xf32>
    %310 = tpu.matmul %308, %309, %cst_59 {dimension_numbers = #tpu.dot_dimension_numbers<[1], [0], [0], [1], [0, 0, 1, 1], [], []>} : vector<32x128xbf16>, vector<128x128xbf16>, vector<32x128xf32> -> vector<32x128xf32>
    %311 = vector.broadcast %3 : vector<1x128xf32> to vector<32x128xf32>
    %312 = arith.addf %310, %311 : vector<32x128xf32>
    %313 = vector.shape_cast %312 : vector<32x128xf32> to vector<2x16x128xf32>
    %c0_60 = arith.constant 0 : index
    %c0_61 = arith.constant 0 : index
    %c0_62 = arith.constant 0 : index
    %314 = vector.load %arg8[%c0_60, %c0_61, %c0_62] : memref<2x16x128xf32, #tpu.memory_space<vmem>>, vector<2x16x128xf32>
    tpu.vector_store %arg8[%c0_60, %c0_61, %c0_62], %313 {strides = array<i32>} : memref<2x16x128xf32, #tpu.memory_space<vmem>>, vector<2x16x128xf32>,
    return
  }
  func.func @transform_0(%arg0: i32) -> (i32, i32, i32) {
    %c0_i32 = arith.constant 0 : i32
    %c0_i32_0 = arith.constant 0 : i32
    %c0_i32_1 = arith.constant 0 : i32
    return %arg0, %c0_i32, %c0_i32_0 : i32, i32, i32
  }
  func.func @transform_1(%arg0: i32) -> (i32, i32) {
    %c0_i32 = arith.constant 0 : i32
    %c0_i32_0 = arith.constant 0 : i32
    %c0_i32_1 = arith.constant 0 : i32
    return %c0_i32, %c0_i32_0 : i32, i32
  }
  func.func @transform_2(%arg0: i32) -> (i32, i32) {
    %c0_i32 = arith.constant 0 : i32
    %c0_i32_0 = arith.constant 0 : i32
    %c0_i32_1 = arith.constant 0 : i32
    return %c0_i32, %c0_i32_0 : i32, i32
  }
  func.func @transform_3(%arg0: i32) -> (i32, i32) {
    %c0_i32 = arith.constant 0 : i32
    %c0_i32_0 = arith.constant 0 : i32
    %c0_i32_1 = arith.constant 0 : i32
    return %c0_i32, %c0_i32_0 : i32, i32
  }
  func.func @transform_4(%arg0: i32) -> (i32, i32) {
    %c0_i32 = arith.constant 0 : i32
    %c0_i32_0 = arith.constant 0 : i32
    %c0_i32_1 = arith.constant 0 : i32
    return %c0_i32, %c0_i32_0 : i32, i32
  }
  func.func @transform_5(%arg0: i32) -> (i32, i32) {
    %c0_i32 = arith.constant 0 : i32
    %c0_i32_0 = arith.constant 0 : i32
    %c0_i32_1 = arith.constant 0 : i32
    return %c0_i32, %c0_i32_0 : i32, i32
  }
  func.func @transform_6(%arg0: i32) -> (i32, i32) {
    %c0_i32 = arith.constant 0 : i32
    %c0_i32_0 = arith.constant 0 : i32
    %c0_i32_1 = arith.constant 0 : i32
    return %c0_i32, %c0_i32_0 : i32, i32
  }
  func.func @transform_7(%arg0: i32) -> (i32, i32, i32) {
    %c0_i32 = arith.constant 0 : i32
    %c0_i32_0 = arith.constant 0 : i32
    %c0_i32_1 = arith.constant 0 : i32
    return %arg0, %c0_i32, %c0_i32_0 : i32, i32, i32
  }
}

</mosaic_0001>

<bundles_post_ra>
// kernel: conv_module_forward.1
= control target key start
LH: loop header
LB: loop body
LE: loop exit
PB: predicated region body
PF: predicated region fallthrough
CT: control target
= control target key end

     0   :  { %s1395_s0 = inlined_call_operand.vmem [shape: f32[2,16,128], index: 0, kind: input, shape index: {}]   ;;  %s1396_s1 = inlined_call_operand.vmem [shape: f32[3,128], index: 1, kind: input, shape index: {}]   ;;  %s1397_s2 = inlined_call_operand.vmem [shape: bf16[128,256], index: 2, kind: input, shape index: {}]   ;;  %s1398_s3 = inlined_call_operand.vmem [shape: f32[1,256], index: 3, kind: input, shape index: {}]   ;;  %s1399_s4 = inlined_call_operand.vmem [shape: f32[7,128], index: 4, kind: input, shape index: {}]   ;;  %s1400_s5 = inlined_call_operand.vmem [shape: f32[3,128], index: 5, kind: input, shape index: {}]   ;;  %s1401_s6 = inlined_call_operand.vmem [shape: bf16[128,128], index: 6, kind: input, shape index: {}]   ;;  %s1402_s7 = inlined_call_operand.hbm [shape: f32[2,16,128], index: 7, kind: output, shape index: {}]  }
   0x1   :  { %v1024_v0 = vld [vmem:[%s1395_s0] sm:$0xff]  ;;  %v1029_v1 = vld [vmem:[%s1395_s0 + $0x8] sm:$0xff]  ;;  %v1042_v5 = vld [vmem:[%s1395_s0 + $0x10] sm:$0xff] }
   0x2   :  { %35 = vadd.xlane.f32.xlu0 %v1024_v0  ;;  %v48_v2 = vmul.f32 %v1024_v0, %v1024_v0  ;;  %v893_v3 = vld [vmem:[%s1397_s2 + $0x4] ss:$8 sps:$4 sm:$0xff]   ;;  %v49_v4 = vmul.f32 %v1029_v1, %v1029_v1  ;;  %v1048_v6 = vld [vmem:[%s1395_s0 + $0x18] sm:$0xff]  ;;  %v50_v7 = vmul.f32 %v1042_v5, %v1042_v5 }
   0x3   :  { %214 = vmatprep.subr.bf16.mxu0 %v893_v3  ;;  %v51_v8 = vmul.f32 %v1048_v6, %v1048_v6 }
   0x4   :  { %52 = vadd.xlane.f32.xlu1 %v48_v2 }
   0x6   :  { %37 = vadd.xlane.f32.xlu0 %v1029_v1 }
   0x8   :  { %54 = vadd.xlane.f32.xlu1 %v49_v4 }
   0xa   :  { %39 = vadd.xlane.f32.xlu0 %v1042_v5 }
   0xc   :  { %41 = vadd.xlane.f32.xlu1 %v1048_v6 }
   0xd   :  { %12 = vsyncpa [#allocation3], 0  ;;  %v895_v9 = vld [vmem:[%s1397_s2] ss:$8 sps:$4 sm:$0xff]   ;;  %v896_v10 = vld [vmem:[%s1397_s2 + $0x14] ss:$8 sps:$4 sm:$0xff]   ;;  %v88_v38 = vlaneseq }
   0xe   :  { %56 = vadd.xlane.f32.xlu0 %v50_v7  ;;  %215 = vmatpush1.bf16.msra.mxu0 %v895_v9  ;;  %v898_v11 = vld [vmem:[%s1397_s2 + $0x10] ss:$8 sps:$4 sm:$0xff]   ;;  %v899_v12 = vld [vmem:[%s1397_s2 + $0x24] ss:$8 sps:$4 sm:$0xff]   ;;  %v901_v13 = vld [vmem:[%s1397_s2 + $0x20] ss:$8 sps:$4 sm:$0xff]  }
   0xf   :  { %216 = vmatprep.subr.bf16.mxu0 %v896_v10  ;;  %v902_v14 = vld [vmem:[%s1397_s2 + $0x34] ss:$8 sps:$4 sm:$0xff]   ;;  %v904_v15 = vld [vmem:[%s1397_s2 + $0x30] ss:$8 sps:$4 sm:$0xff]   ;;  %v905_v16 = vld [vmem:[%s1397_s2 + $0x44] ss:$8 sps:$4 sm:$0xff]  }
  0x10   :  { %58 = vadd.xlane.f32.xlu1 %v51_v8  ;;  %v907_v17 = vld [vmem:[%s1397_s2 + $0x40] ss:$8 sps:$4 sm:$0xff]   ;;  %v908_v18 = vld [vmem:[%s1397_s2 + $0x54] ss:$8 sps:$4 sm:$0xff]   ;;  %v910_v19 = vld [vmem:[%s1397_s2 + $0x50] ss:$8 sps:$4 sm:$0xff]  }
  0x11   :  { %v911_v20 = vld [vmem:[%s1397_s2 + $0x64] ss:$8 sps:$4 sm:$0xff]   ;;  %v913_v21 = vld [vmem:[%s1397_s2 + $0x60] ss:$8 sps:$4 sm:$0xff]   ;;  %v914_v22 = vld [vmem:[%s1397_s2 + $0x74] ss:$8 sps:$4 sm:$0xff]  }
  0x12   :  { %217 = vmatpush1.bf16.msra.mxu0 %v898_v11  ;;  %v977_v23 = vmov 0   ;;  %v916_v24 = vld [vmem:[%s1397_s2 + $0x70] ss:$8 sps:$4 sm:$0xff]   ;;  %v1102_v46 = vshrl.u32 %v88_v38, 7  ;;  %v1110_v55 = vld [vmem:[%s1396_s1] sm:$0x7] }
  0x13   :  { %218 = vmatprep.subr.bf16.mxu0 %v899_v12  ;;  %246 = vmatprep.mubr.bf16.mxu0 %v977_v23  ;;  %vm438_vm6 = vcmask 1040384   ;;  %vm440_vm7 = vcmask 1041408   ;;  %vm442_vm8 = vcmask 1042432   ;;  %vm444_vm9 = vcmask 1044480  }
  0x14   :  { %v1105_v52 = vsub.s32 0, %v1102_v46  ;;  %v1116_v61 = vsub.s32 1, %v1102_v46  ;;  %vm291_vm0 = vcmp.lt.s32.totalorder %v1102_v46, 3  ;;  %vm304_vm1 = vcmp.lt.s32.totalorder %v1102_v46, 2 }
  0x15   :  { %vm317_vm2 = vcmp.lt.s32.totalorder %v1102_v46, 1  ;;  %vm338_vm3 = vcmp.lt.s32.totalorder %v1102_v46, 7  ;;  %vm351_vm4 = vcmp.lt.s32.totalorder %v1102_v46, 6  ;;  %vm364_vm5 = vcmp.lt.s32.totalorder %v1102_v46, 5 }
  0x16   :  { %219 = vmatpush1.bf16.msra.mxu0 %v901_v13  ;;  %v91_v60 = vrot.slane %v1110_v55, %v1105_v52  ;;  %v99_v4 = vrot.slane %v1110_v55, %v1116_v61  ;;  %vm446_vm10 = vcmask 1045504   ;;  %vm448_vm11 = vcmask 1046528  }
  0x17   :  { %220 = vmatprep.subr.bf16.mxu0 %v902_v14 }
  0x1a   :  { %221 = vmatpush1.bf16.msra.mxu0 %v904_v15 }
  0x1b   :  { %222 = vmatprep.subr.bf16.mxu0 %v905_v16 }
  0x1e   :  { %223 = vmatpush1.bf16.msra.mxu0 %v907_v17 }
  0x1f   :  { %224 = vmatprep.subr.bf16.mxu0 %v908_v18 }
  0x22   :  { %225 = vmatpush1.bf16.msra.mxu0 %v910_v19 }
  0x23   :  { %226 = vmatprep.subr.bf16.mxu0 %v911_v20 }
  0x26   :  { %227 = vmatpush1.bf16.msra.mxu0 %v913_v21 }
  0x27   :  { %228 = vmatprep.subr.bf16.mxu0 %v914_v22 }
  0x2a   :  { %229 = vmatpush1.bf16.msra.mxu0 %v916_v24 }
  0x8f   :  { %v36_v25 = vpop.xlane.xlu0 %35 }
  0x90   :  { %v44_v26 = vmul.f32 0.0078125, %v36_v25 }
  0x91   :  { %v53_v27 = vpop.xlane.xlu1 %52 }
  0x92   :  { %v68_v28 = vmul.f32 %v44_v26, %v44_v26  ;;  %v60_v29 = vmul.f32 0.0078125, %v53_v27  ;;  %v64_v56 = vsub.f32 %v1024_v0, %v44_v26 }
  0x93   :  { %v38_v30 = vpop.xlane.xlu0 %37 }
  0x94   :  { %v72_v31 = vsub.f32 %v60_v29, %v68_v28  ;;  %v45_v32 = vmul.f32 0.0078125, %v38_v30 }
  0x95   :  { %v55_v33 = vpop.xlane.xlu1 %54 }
  0x96   :  { %v76_v34 = vadd.f32 1e-05, %v72_v31  ;;  %v69_v35 = vmul.f32 %v45_v32, %v45_v32  ;;  %v61_v36 = vmul.f32 0.0078125, %v55_v33  ;;  %v65_v62 = vsub.f32 %v1029_v1, %v45_v32 }
  0x97   :  { %v40_v37 = vpop.xlane.xlu0 %39 }
  0x98   :  { %925 = vrsqrt.f32 %v76_v34  ;;  %v73_v39 = vsub.f32 %v61_v36, %v69_v35  ;;  %v46_v40 = vmul.f32 0.0078125, %v40_v37  ;;  %v330_v35 = vsub.s32 3, %v1102_v46  ;;  %v1132_v36 = vld [vmem:[%s1399_s4] sm:$0x7f] }
  0x99   :  { %v42_v41 = vpop.xlane.xlu1 %41 }
  0x9a   :  { %v77_v42 = vadd.f32 1e-05, %v73_v39  ;;  %v70_v43 = vmul.f32 %v46_v40, %v46_v40  ;;  %v47_v44 = vmul.f32 0.0078125, %v42_v41  ;;  %v66_v7 = vsub.f32 %v1042_v5, %v46_v40  ;;  %v122_v5 = vld [vmem:[%s1398_s3] sm:$0x3] }
  0x9b   :  { %v57_v45 = vpop.xlane.xlu0 %56  ;;  %v131_v20 = vrot.slane %v122_v5, %v1116_v61  ;;  %v127_v38 = vrot.slane %v122_v5, %v1105_v52  ;;  %v1136_v39 = vsub.s32 2, %v1102_v46  ;;  %v1139_v41 = vrot.slane %v1132_v36, %v330_v35 }
  0x9c   :  { %927 = vrsqrt.f32 %v77_v42  ;;  %v62_v47 = vmul.f32 0.0078125, %v57_v45  ;;  %v71_v49 = vmul.f32 %v47_v44, %v47_v44  ;;  %v67_v11 = vsub.f32 %v1048_v6, %v47_v44 }
  0x9d   :  { %v59_v48 = vpop.xlane.xlu1 %58  ;;  %v343_v42 = vsub.s32 4, %v1102_v46  ;;  %v1145_v44 = vrot.slane %v1132_v36, %v1105_v52  ;;  %v356_v45 = vsub.s32 5, %v1102_v46 }
  0x9e   :  { %v74_v50 = vsub.f32 %v62_v47, %v70_v43  ;;  %v63_v51 = vmul.f32 0.0078125, %v59_v48  ;;  %v1151_v48 = vrot.slane %v1132_v36, %v1116_v61 }
  0xa0   :  { %v78_v53 = vadd.f32 1e-05, %v74_v50  ;;  %v75_v54 = vsub.f32 %v63_v51, %v71_v49  ;;  %v369_v49 = vsub.s32 6, %v1102_v46 }
  0xa2   :  { %v926_v57 = vpop.eup %925  ;;  %929 = vrsqrt.f32 %v78_v53  ;;  %v79_v58 = vadd.f32 1e-05, %v75_v54  ;;  %v1158_v54 = vld [vmem:[%s1400_s5] sm:$0x7] }
  0xa3   :  { %v84_v59 = vmul.f32 %v926_v57, %v64_v56  ;;  %v1162_v56 = vrot.slane %v1132_v36, %v1136_v39  ;;  %v1166_v57 = vrot.slane %v1132_v36, %v343_v42 }
  0xa4   :  { %931 = vrsqrt.f32 %v79_v58 }
  0xa5   :  { %v92_v3 = vmul.f32 %v91_v60, %v84_v59 }
  0xa6   :  { %v928_v63 = vpop.eup %927 }
  0xa7   :  { %v85_v2 = vmul.f32 %v928_v63, %v65_v62  ;;  %v100_v8 = vadd.f32 %v99_v4, %v92_v3  ;;  %v1173_v62 = vrot.slane %v1132_v36, %v356_v45  ;;  %v1176_v3 = vrot.slane %v1132_v36, %v369_v49 }
  0xa9   :  { %v93_v0 = vmul.f32 %v91_v60, %v85_v2 }
  0xab   :  { %v101_v9 = vadd.f32 %v99_v4, %v93_v0 }
  0xac   :  { %v930_v10 = vpop.eup %929 }
  0xad   :  { %v104_v12 = vpack.c.bf16 %v101_v9, %v100_v8  ;;  %v86_v13 = vmul.f32 %v930_v10, %v66_v7 }
  0xae   :  { %v932_v14 = vpop.eup %931 }
  0xaf   :  { %247 = vmatmul.mubr.bf16.vlgmr.msra.gmra.mrb[0].mxu0 %v104_v12  ;;  %v87_v15 = vmul.f32 %v932_v14, %v67_v11  ;;  %v94_v1 = vmul.f32 %v91_v60, %v86_v13 }
  0xb0   :  { %256 = vmatprep.mubr.bf16.mxu0 %v977_v23 }
  0xb1   :  { %v95_v16 = vmul.f32 %v91_v60, %v87_v15  ;;  %v102_v17 = vadd.f32 %v99_v4, %v94_v1 }
  0xb3   :  { %v103_v18 = vadd.f32 %v99_v4, %v95_v16  ;;  %v1180_v4 = vrot.slane %v1158_v54, %v1105_v52 }
  0xb5   :  { %v105_v19 = vpack.c.bf16 %v103_v18, %v102_v17 }
  0xb7   :  { %257 = vmatmul.mubr.bf16.gmra.mrb[4].mxu0 %v105_v19 }
 0x182   :  { %v248_v6 = vpop.f32.mrb[0].mxu0 }
 0x183   :  { %v250_v21 = vpop.f32.mrb[1].mxu0  ;;  %v249_v50 = vadd.f32 %v248_v6, %v127_v38 }
 0x184   :  { %v251_v22 = vadd.f32 %v250_v21, %v131_v20  ;;  %v252_v24 = vpop.f32.mrb[2].mxu0 }
 0x185   :  { %v254_v25 = vpop.f32.mrb[3].mxu0  ;;  %v253_v59 = vadd.f32 %v252_v24, %v127_v38 }
 0x186   :  { %v267_v26 = vmul.f32 0.5, %v251_v22  ;;  %v255_v27 = vadd.f32 %v254_v25, %v131_v20 }
 0x188   :  { %933 = vtanh.f32 %v267_v26  ;;  %v268_v23 = vmul.f32 0.5, %v255_v27 }
 0x18a   :  { %935 = vtanh.f32 %v268_v23  ;;  %v258_v28 = vpop.f32.mrb[4].mxu0 }
 0x18b   :  { %v260_v29 = vpop.f32.mrb[5].mxu0  ;;  %v259_v63 = vadd.f32 %v258_v28, %v127_v38 }
 0x18c   :  { %v261_v30 = vadd.f32 %v260_v29, %v131_v20  ;;  %v262_v31 = vpop.f32.mrb[6].mxu0 }
 0x18d   :  { %v264_v32 = vpop.f32.mrb[7].mxu0  ;;  %v263_v2 = vadd.f32 %v262_v31, %v127_v38 }
 0x18e   :  { %v269_v33 = vmul.f32 0.5, %v261_v30  ;;  %v265_v34 = vadd.f32 %v264_v32, %v131_v20 }
 0x190   :  { %937 = vtanh.f32 %v269_v33  ;;  %v270_v37 = vmul.f32 0.5, %v265_v34 }
 0x192   :  { %v934_v40 = vpop.eup %933  ;;  %939 = vtanh.f32 %v270_v37 }
 0x193   :  { %v275_v43 = vadd.f32 1.0, %v934_v40 }
 0x194   :  { %v936_v47 = vpop.eup %935 }
 0x195   :  { %v279_v51 = vmul.f32 0.5, %v275_v43  ;;  %v276_v53 = vadd.f32 1.0, %v936_v47 }
 0x197   :  { %v1170_v58 = vmul.f32 %v279_v51, %v249_v50  ;;  %v280_v60 = vmul.f32 0.5, %v276_v53 }
 0x199   :  { %v1182_v0 = vmul.f32 %v280_v60, %v253_v59  ;;  %v287_v7 = vrot.slane %v1170_v58, 5  ;;  %v302_v8 = vrot.slane %v1170_v58, 6  ;;  %v315_v9 = vrot.slane %v1170_v58, 7 }
 0x19a   :  { %v938_v10 = vpop.eup %937  ;;  %v332_v11 = vmul.f32 %v1139_v41, %v1170_v58  ;;  %v336_v12 = vrot.slane %v1170_v58, 1  ;;  %v349_v13 = vrot.slane %v1170_v58, 2  ;;  %v362_v14 = vrot.slane %v1170_v58, 3 }
 0x19b   :  { %v277_v52 = vadd.f32 1.0, %v938_v10  ;;  %v288_v15 = vrot.slane %v1182_v0, 5  ;;  %v303_v1 = vrot.slane %v1182_v0, 6  ;;  %v316_v16 = vrot.slane %v1182_v0, 7 }
 0x19c   :  { %v940_v17 = vpop.eup %939  ;;  %v337_v18 = vrot.slane %v1182_v0, 1  ;;  %v350_v19 = vrot.slane %v1182_v0, 2  ;;  %v363_v5 = vrot.slane %v1182_v0, 3  ;;  %v1200_v20 = vmul.f32 %v1139_v41, %v1182_v0 }
 0x19d   :  { %v281_v6 = vmul.f32 0.5, %v277_v52  ;;  %v278_v21 = vadd.f32 1.0, %v940_v17  ;;  %v293_v22 = vsel %vm291_vm0, %v288_v15, %v287_v7  ;;  %v306_v24 = vsel %vm304_vm1, %v303_v1, %v302_v8 }
 0x19e   :  { %v298_v25 = vmul.f32 %v1145_v44, %v293_v22  ;;  %v311_v26 = vmul.f32 %v1151_v48, %v306_v24  ;;  %v319_v27 = vsel %vm317_vm2, %v316_v16, %v315_v9  ;;  %v339_v23 = vsel %vm338_vm3, %v336_v12, %v337_v18 }
 0x19f   :  { %v1212_v28 = vmul.f32 %v281_v6, %v259_v63  ;;  %v282_v29 = vmul.f32 0.5, %v278_v21  ;;  %v324_v30 = vmul.f32 %v1162_v56, %v319_v27  ;;  %v345_v31 = vmul.f32 %v1166_v57, %v339_v23 }
 0x1a0   :  { %v313_v32 = vadd.f32 %v311_v26, %v298_v25  ;;  %v352_v33 = vsel %vm351_vm4, %v349_v13, %v350_v19  ;;  %v365_v34 = vsel %vm364_vm5, %v362_v14, %v363_v5  ;;  %v378_v35 = vmul.f32 %v288_v15, %v1132_v36 }
 0x1a1   :  { %v1221_v37 = vmul.f32 %v282_v29, %v263_v2  ;;  %v358_v38 = vmul.f32 %v1173_v62, %v352_v33  ;;  %v371_v40 = vmul.f32 %v1176_v3, %v365_v34  ;;  %v389_v42 = vmul.f32 %v303_v1, %v1132_v36 }
 0x1a2   :  { %v326_v43 = vadd.f32 %v324_v30, %v313_v32  ;;  %v381_v45 = vrot.slane %v378_v35, 1  ;;  %v384_v47 = vrot.slane %v378_v35, 2  ;;  %v397_v49 = vmul.f32 %v316_v16, %v1132_v36 }
 0x1a3   :  { %v392_v50 = vrot.slane %v389_v42, 1  ;;  %v292_v51 = vsel %vm291_vm0, %v287_v7, %v288_v15  ;;  %v305_v53 = vsel %vm304_vm1, %v302_v8, %v303_v1  ;;  %v318_v59 = vsel %vm317_vm2, %v315_v9, %v316_v16 }
 0x1a4   :  { %v334_v60 = vadd.f32 %v332_v11, %v326_v43  ;;  %v383_v63 = vadd.f32 %v381_v45, %v378_v35  ;;  %v427_v2 = vrot.slane %v397_v49, 6  ;;  %v299_v0 = vmul.f32 %v1145_v44, %v292_v51 }
 0x1a5   :  { %v394_v10 = vadd.f32 %v392_v50, %v389_v42  ;;  %v312_v52 = vmul.f32 %v1151_v48, %v305_v53  ;;  %v325_v17 = vmul.f32 %v1162_v56, %v318_v59  ;;  %v340_v6 = vsel %vm338_vm3, %v337_v18, %v336_v12 }
 0x1a6   :  { %v347_v7 = vadd.f32 %v345_v31, %v334_v60  ;;  %v386_v15 = vadd.f32 %v384_v47, %v383_v63  ;;  %v346_v8 = vmul.f32 %v1166_v57, %v340_v6  ;;  %v353_v9 = vsel %vm351_vm4, %v350_v19, %v349_v13 }
 0x1a7   :  { %v424_v11 = vrot.slane %v394_v10, 7  ;;  %v314_v1 = vadd.f32 %v312_v52, %v299_v0  ;;  %v359_v16 = vmul.f32 %v1173_v62, %v353_v9  ;;  %v366_v21 = vsel %vm364_vm5, %v363_v5, %v362_v14 }
 0x1a8   :  { %v360_v22 = vadd.f32 %v358_v38, %v347_v7  ;;  %v372_v24 = vmul.f32 %v1176_v3, %v366_v21  ;;  %v402_v12 = vmul.f32 %v349_v13, %v1132_v36  ;;  %v406_v18 = vmul.f32 %v362_v14, %v1132_v36 }
 0x1a9   :  { %v439_v25 = vsel %vm438_vm6, %v386_v15, %v424_v11  ;;  %v327_v26 = vadd.f32 %v325_v17, %v314_v1  ;;  %v412_v27 = vrot.slane %v1170_v58, 4  ;;  %v519_v19 = vrot.slane %v1212_v28, 5 }
 0x1aa   :  { %v373_v23 = vadd.f32 %v371_v40, %v360_v22  ;;  %v441_v29 = vsel %vm440_vm7, %v439_v25, %v427_v2  ;;  %v409_v30 = vrot.slane %v406_v18, 1  ;;  %v430_v31 = vrot.slane %v402_v12, 1 }
 0x1ab   :  { %v443_v5 = vsel %vm442_vm8, %v441_v29, 0.0  ;;  %v335_v32 = vadd.f32 %v1200_v20, %v327_v26  ;;  %v414_v13 = vmul.f32 %v412_v27, %v1132_v36  ;;  %v520_v14 = vrot.slane %v1221_v37, 5 }
 0x1ac   :  { %v450_v33 = vsub.f32 %v373_v23, %v443_v5  ;;  %v411_v34 = vadd.f32 %v409_v30, %v406_v18  ;;  %v445_v35 = vsel %vm444_vm9, 0.0, %v430_v31  ;;  %v527_v58 = vrot.slane %v1212_v28, 6 }
 0x1ad   :  { %v348_v38 = vadd.f32 %v346_v8, %v335_v32  ;;  %v417_v40 = vrot.slane %v414_v13, 1  ;;  %v420_v42 = vrot.slane %v414_v13, 2  ;;  %v522_v43 = vsel %vm291_vm0, %v520_v14, %v519_v19 }
 0x1ae   :  { %v1262_v20 = vadd.f32 %v1180_v4, %v450_v33  ;;  %v433_v45 = vrot.slane %v411_v34, 7  ;;  %v523_v47 = vmul.f32 %v522_v43, %v1145_v44  ;;  %v528_v49 = vrot.slane %v1221_v37, 6 }
 0x1af   :  { %v361_v50 = vadd.f32 %v359_v16, %v348_v38  ;;  %v419_v51 = vadd.f32 %v417_v40, %v414_v13  ;;  %v535_v53 = vrot.slane %v1212_v28, 7  ;;  %v536_v59 = vrot.slane %v1221_v37, 7 }
 0x1b0   :  { %458 = vadd.xlane.f32.xlu0 %v1262_v20  ;;  %v447_v60 = vsel %vm446_vm10, %v445_v35, %v433_v45  ;;  %v473_v63 = vmul.f32 %v1262_v20, %v1262_v20  ;;  %v530_v2 = vsel %vm304_vm1, %v528_v49, %v527_v58  ;;  %v547_v7 = vrot.slane %v1212_v28, 1 }
 0x1b1   :  { %v374_v0 = vadd.f32 %v372_v24, %v361_v50  ;;  %v422_v10 = vadd.f32 %v420_v42, %v419_v51  ;;  %v531_v52 = vmul.f32 %v530_v2, %v1151_v48  ;;  %v538_v17 = vsel %vm317_vm2, %v536_v59, %v535_v53 }
 0x1b2   :  { %v539_v6 = vmul.f32 %v538_v17, %v1162_v56  ;;  %v548_v15 = vrot.slane %v1221_v37, 1  ;;  %v555_v8 = vrot.slane %v1212_v28, 2  ;;  %v556_v1 = vrot.slane %v1221_v37, 2 }
 0x1b3   :  { %v436_v9 = vrot.slane %v422_v10, 5  ;;  %v533_v11 = vadd.f32 %v531_v52, %v523_v47  ;;  %v563_v16 = vrot.slane %v1212_v28, 3  ;;  %v564_v22 = vrot.slane %v1221_v37, 3 }
 0x1b4   :  { %475 = vadd.xlane.f32.xlu0 %v473_v63  ;;  %v549_v21 = vsel %vm338_vm3, %v547_v7, %v548_v15  ;;  %v574_v24 = vmul.f32 %v520_v14, %v1132_v36  ;;  %v585_v12 = vmul.f32 %v528_v49, %v1132_v36  ;;  %v543_v26 = vmul.f32 %v1139_v41, %v1212_v28 }
 0x1b5   :  { %v449_v18 = vsel %vm448_vm11, %v447_v60, %v436_v9  ;;  %v541_v25 = vadd.f32 %v539_v6, %v533_v11  ;;  %v557_v27 = vsel %vm351_vm4, %v555_v8, %v556_v1  ;;  %v551_v29 = vmul.f32 %v549_v21, %v1166_v57 }
 0x1b6   :  { %v451_v23 = vsub.f32 %v374_v0, %v449_v18  ;;  %v565_v30 = vsel %vm364_vm5, %v563_v16, %v564_v22  ;;  %v577_v31 = vrot.slane %v574_v24, 1  ;;  %v559_v32 = vmul.f32 %v557_v27, %v1173_v62 }
 0x1b7   :  { %v545_v5 = vadd.f32 %v543_v26, %v541_v25  ;;  %v580_v13 = vrot.slane %v574_v24, 2  ;;  %v588_v33 = vrot.slane %v585_v12, 1  ;;  %v593_v38 = vmul.f32 %v536_v59, %v1132_v36 }
 0x1b8   :  { %v1298_v34 = vadd.f32 %v1180_v4, %v451_v23  ;;  %v579_v35 = vadd.f32 %v577_v31, %v574_v24  ;;  %v521_v40 = vsel %vm291_vm0, %v519_v19, %v520_v14  ;;  %v529_v47 = vsel %vm304_vm1, %v527_v58, %v528_v49 }
 0x1b9   :  { %v553_v42 = vadd.f32 %v551_v29, %v545_v5  ;;  %v590_v43 = vadd.f32 %v588_v33, %v585_v12  ;;  %v524_v45 = vmul.f32 %v521_v40, %v1145_v44  ;;  %v567_v51 = vmul.f32 %v565_v30, %v1176_v3  ;;  %v918_v33 = vld [vmem:[%s1401_s6 + $0x8] sm:$0xff]  }
 0x1ba   :  { %460 = vadd.xlane.f32.xlu1 %v1298_v34  ;;  %v474_v50 = vmul.f32 %v1298_v34, %v1298_v34  ;;  %v582_v60 = vadd.f32 %v580_v13, %v579_v35  ;;  %v532_v63 = vmul.f32 %v529_v47, %v1151_v48  ;;  %v623_v19 = vrot.slane %v593_v38, 6  ;;  %v917_v13 = vld [vmem:[%s1401_s6] sm:$0xff]   ;;  %v920_v35 = vld [vmem:[%s1401_s6 + $0x18] sm:$0xff]   ;;  %v922_v40 = vld [vmem:[%s1401_s6 + $0x28] sm:$0xff]  }
 0x1bb   :  { %v561_v2 = vadd.f32 %v559_v32, %v553_v42  ;;  %v620_v0 = vrot.slane %v590_v43, 7  ;;  %v537_v14 = vsel %vm317_vm2, %v535_v53, %v536_v59  ;;  %v550_v58 = vsel %vm338_vm3, %v548_v15, %v547_v7  ;;  %869 = vmatprep.subr.bf16.mxu1 %v917_v13  ;;  %v921_v38 = vld [vmem:[%s1401_s6 + $0x20] sm:$0xff]   ;;  %v923_v42 = vld [vmem:[%s1401_s6 + $0x30] sm:$0xff]   ;;  %v924_v43 = vld [vmem:[%s1401_s6 + $0x38] sm:$0xff]  }
 0x1bc   :  { %v534_v44 = vadd.f32 %v532_v63, %v524_v45  ;;  %v540_v10 = vmul.f32 %v537_v14, %v1162_v56  ;;  %v558_v49 = vsel %vm351_vm4, %v556_v1, %v555_v8  ;;  %v544_v9 = vmul.f32 %v1139_v41, %v1221_v37  ;;  %870 = vmatpush3.bf16.msra.mxu1 %v917_v13 }
 0x1bd   :  { %v569_v52 = vadd.f32 %v567_v51, %v561_v2  ;;  %v634_v17 = vsel %vm438_vm6, %v582_v60, %v620_v0  ;;  %v566_v53 = vsel %vm364_vm5, %v564_v22, %v563_v16  ;;  %v598_v59 = vmul.f32 %v555_v8, %v1132_v36  ;;  %871 = vmatprep.subr.bf16.mxu1 %v918_v33 }
 0x1be   :  { %477 = vadd.xlane.f32.xlu1 %v474_v50  ;;  %v635_v48 = vsel %vm440_vm7, %v634_v17, %v623_v19  ;;  %v542_v6 = vadd.f32 %v540_v10, %v534_v44  ;;  %v602_v7 = vmul.f32 %v563_v16, %v1132_v36  ;;  %v608_v15 = vrot.slane %v1212_v28, 4 }
 0x1bf   :  { %v636_v56 = vsel %vm442_vm8, %v635_v48, 0.0  ;;  %v552_v21 = vmul.f32 %v550_v58, %v1166_v57  ;;  %v560_v37 = vmul.f32 %v558_v49, %v1173_v62  ;;  %v626_v8 = vrot.slane %v598_v59, 1 }
 0x1c0   :  { %v640_v11 = vsub.f32 %v569_v52, %v636_v56  ;;  %v546_v1 = vadd.f32 %v544_v9, %v542_v6  ;;  %v605_v24 = vrot.slane %v602_v7, 1  ;;  %v610_v12 = vmul.f32 %v608_v15, %v1132_v36  ;;  %872 = vmatpush3.bf16.msra.mxu1 %v918_v33 }
 0x1c1   :  { %v568_v28 = vmul.f32 %v566_v53, %v1176_v3  ;;  %v637_v29 = vsel %vm444_vm9, 0.0, %v626_v8 }
 0x1c2   :  { %v1333_v41 = vadd.f32 %v640_v11, %v1180_v4  ;;  %v554_v46 = vadd.f32 %v552_v21, %v546_v1  ;;  %v607_v22 = vadd.f32 %v605_v24, %v602_v7  ;;  %v613_v18 = vrot.slane %v610_v12, 1 }
 0x1c3   :  { %v616_v26 = vrot.slane %v610_v12, 2 }
 0x1c4   :  { %644 = vadd.xlane.f32.xlu0 %v1333_v41  ;;  %v562_v16 = vadd.f32 %v560_v37, %v554_v46  ;;  %v615_v25 = vadd.f32 %v613_v18, %v610_v12  ;;  %v629_v57 = vrot.slane %v607_v22, 7  ;;  %v658_v36 = vmul.f32 %v1333_v41, %v1333_v41 }
 0x1c6   :  { %v570_v27 = vadd.f32 %v568_v28, %v562_v16  ;;  %v618_v23 = vadd.f32 %v616_v26, %v615_v25  ;;  %v638_v62 = vsel %vm446_vm10, %v637_v29, %v629_v57 }
 0x1c8   :  { %660 = vadd.xlane.f32.xlu0 %v658_v36  ;;  %v632_v30 = vrot.slane %v618_v23, 5 }
 0x1ca   :  { %v639_v31 = vsel %vm448_vm11, %v638_v62, %v632_v30 }
 0x1cb   :  { %v641_v5 = vsub.f32 %v570_v27, %v639_v31 }
 0x1cd   :  { %v1344_v32 = vadd.f32 %v641_v5, %v1180_v4  ;;  %v919_v4 = vld [vmem:[%s1401_s6 + $0x10] sm:$0xff]   ;;  %s978_s6 = smov [#allocation2]  }
 0x1ce   :  { %873 = vmatprep.subr.bf16.mxu1 %v919_v4  ;;  %s824_s12 = sshll.u32 %s978_s6, 4  ;;  %s825_s12 = int_to_ptr.vmem [resolvable:$true] %s824_s12 }
 0x1cf   :  { %646 = vadd.xlane.f32.xlu1 %v1344_v32  ;;  %v659_v3 = vmul.f32 %v1344_v32, %v1344_v32  ;;  %874 = vmatpush3.bf16.msra.mxu1 %v919_v4  ;;  %s953_s0 = scalar_lea.vmem %s825_s12, 512  ;;  %p958_p1 = scmp.lt.s32.totalorder %s825_s12, %s825_s12 }
 0x1d0   :  { %875 = vmatprep.subr.bf16.mxu1 %v920_v35  ;;  %p954_p0 = scmp.ne.s32.totalorder %s825_s12, %s953_s0  ;;  %p959_p2 = scmp.lt.s32.totalorder %s953_s0, %s953_s0 }
 0x1d2   :  { %p960_p3 = por %p959_p2, %p958_p1 }
 0x1d3   :  { %662 = vadd.xlane.f32.xlu1 %v659_v3  ;;  %876 = vmatpush3.bf16.msra.mxu1 %v920_v35  ;;  %v500_v3 = vrot.slane %v1158_v54, %v1116_v61 }
 0x1d4   :  { %877 = vmatprep.subr.bf16.mxu1 %v921_v38  ;;  %p961_p4 = pnand %p960_p3, %p954_p0 }
 0x1d7   :  { %878 = vmatpush3.bf16.msra.mxu1 %v921_v38 }
 0x1d8   :  { %879 = vmatprep.subr.bf16.mxu1 %v922_v40 }
 0x1db   :  { %880 = vmatpush3.bf16.msra.mxu1 %v922_v40  ;;  %v506_v40 = vrot.slane %v1158_v54, %v1136_v39 }
 0x1dc   :  { %881 = vmatprep.subr.bf16.mxu1 %v923_v42 }
 0x1df   :  { %882 = vmatpush3.bf16.msra.mxu1 %v923_v42 }
 0x1e0   :  { %883 = vmatprep.subr.bf16.mxu1 %v924_v43 }
 0x1e3   :  { %884 = vmatpush3.bf16.msra.mxu1 %v924_v43 }
 0x23d   :  { %v459_v45 = vpop.xlane.xlu0 %458 }
 0x23e   :  { %v462_v47 = vmul.f32 0.0078125, %v459_v45 }
 0x241   :  { %v476_v51 = vpop.xlane.xlu0 %475 }
 0x242   :  { %v479_v2 = vmul.f32 0.0078125, %v476_v51 }
 0x247   :  { %v461_v50 = vpop.xlane.xlu1 %460 }
 0x248   :  { %v463_v60 = vmul.f32 0.0078125, %v461_v50 }
 0x24a   :  { %v464_v63 = vadd.f32 %v463_v60, %v462_v47 }
 0x24b   :  { %v478_v0 = vpop.xlane.xlu1 %477 }
 0x24c   :  { %v465_v19 = vrot.slane %v464_v63, 4  ;;  %v480_v14 = vmul.f32 0.0078125, %v478_v0 }
 0x24e   :  { %v466_v44 = vadd.f32 %v465_v19, %v464_v63  ;;  %v481_v10 = vadd.f32 %v480_v14, %v479_v2 }
 0x250   :  { %v467_v58 = vrot.slane %v466_v44, 2  ;;  %v482_v49 = vrot.slane %v481_v10, 4 }
 0x251   :  { %v645_v56 = vpop.xlane.xlu0 %644 }
 0x252   :  { %v468_v52 = vadd.f32 %v467_v58, %v466_v44  ;;  %v483_v17 = vadd.f32 %v482_v49, %v481_v10  ;;  %v648_v21 = vmul.f32 0.0078125, %v645_v56 }
 0x254   :  { %v469_v48 = vrot.slane %v468_v52, 1  ;;  %v484_v6 = vrot.slane %v483_v17, 2 }
 0x255   :  { %v661_v12 = vpop.xlane.xlu0 %660 }
 0x256   :  { %v470_v9 = vadd.f32 %v469_v48, %v468_v52  ;;  %v485_v53 = vadd.f32 %v484_v6, %v483_v17  ;;  %v664_v8 = vmul.f32 0.0078125, %v661_v12 }
 0x258   :  { %v472_v59 = vmul.f32 0.0625, %v470_v9  ;;  %v486_v7 = vrot.slane %v485_v53, 1 }
 0x25a   :  { %v487_v15 = vadd.f32 %v486_v7, %v485_v53  ;;  %v491_v11 = vmul.f32 %v472_v59, %v472_v59  ;;  %v489_v31 = vsub.f32 %v1262_v20, %v472_v59  ;;  %v490_v5 = vsub.f32 %v1298_v34, %v472_v59 }
 0x25c   :  { %v488_v1 = vmul.f32 0.0625, %v487_v15  ;;  %v647_v24 = vpop.xlane.xlu1 %646 }
 0x25d   :  { %v649_v37 = vmul.f32 0.0078125, %v647_v24 }
 0x25e   :  { %v492_v46 = vsub.f32 %v488_v1, %v491_v11 }
 0x25f   :  { %v650_v18 = vadd.f32 %v649_v37, %v648_v21 }
 0x260   :  { %v493_v22 = vadd.f32 1e-05, %v492_v46  ;;  %v663_v16 = vpop.xlane.xlu1 %662 }
 0x261   :  { %v651_v28 = vrot.slane %v650_v18, 4  ;;  %v665_v25 = vmul.f32 0.0078125, %v663_v16  ;;  %v717_v16 = vrot.slane %v1110_v55, %v1136_v39 }
 0x262   :  { %941 = vrsqrt.f32 %v493_v22 }
 0x263   :  { %v652_v26 = vadd.f32 %v651_v28, %v650_v18  ;;  %v666_v57 = vadd.f32 %v665_v25, %v664_v8 }
 0x265   :  { %v653_v27 = vrot.slane %v652_v26, 2  ;;  %v667_v36 = vrot.slane %v666_v57, 4 }
 0x267   :  { %v654_v23 = vadd.f32 %v653_v27, %v652_v26  ;;  %v668_v29 = vadd.f32 %v667_v36, %v666_v57 }
 0x269   :  { %v655_v62 = vrot.slane %v654_v23, 1  ;;  %v669_v30 = vrot.slane %v668_v29, 2 }
 0x26b   :  { %v656_v33 = vadd.f32 %v655_v62, %v654_v23  ;;  %v670_v4 = vadd.f32 %v669_v30, %v668_v29 }
 0x26c   :  { %v942_v13 = vpop.eup %941 }
 0x26d   :  { %v495_v35 = vmul.f32 %v942_v13, %v489_v31  ;;  %v496_v38 = vmul.f32 %v942_v13, %v490_v5  ;;  %v657_v42 = vmul.f32 0.0625, %v656_v33  ;;  %v671_v43 = vrot.slane %v670_v4, 1 }
 0x26f   :  { %v501_v45 = vmul.f32 %v500_v3, %v495_v35  ;;  %v502_v47 = vmul.f32 %v500_v3, %v496_v38  ;;  %v672_v50 = vadd.f32 %v671_v43, %v670_v4  ;;  %v676_v60 = vmul.f32 %v657_v42, %v657_v42 }
 0x270   :  { %v674_v54 = vsub.f32 %v1333_v41, %v657_v42  ;;  %v675_v10 = vsub.f32 %v1344_v32, %v657_v42 }
 0x271   :  { %v507_v51 = vadd.f32 %v506_v40, %v501_v45  ;;  %v508_v20 = vadd.f32 %v506_v40, %v502_v47  ;;  %v673_v34 = vmul.f32 0.0625, %v672_v50 }
 0x273   :  { %v509_v63 = vmul.f32 0.5, %v507_v51  ;;  %v510_v2 = vmul.f32 0.5, %v508_v20  ;;  %v677_v61 = vsub.f32 %v673_v34, %v676_v60 }
 0x275   :  { %943 = vtanh.f32 %v509_v63  ;;  %v678_v0 = vadd.f32 1e-05, %v677_v61 }
 0x276   :  { %945 = vtanh.f32 %v510_v2 }
 0x277   :  { %947 = vrsqrt.f32 %v678_v0 }
 0x27f   :  { %v944_v19 = vpop.eup %943 }
 0x280   :  { %v946_v14 = vpop.eup %945  ;;  %v513_v44 = vadd.f32 1.0, %v944_v19 }
 0x281   :  { %v514_v58 = vadd.f32 1.0, %v946_v14  ;;  %v948_v49 = vpop.eup %947 }
 0x282   :  { %v515_v52 = vmul.f32 0.5, %v513_v44  ;;  %v680_v48 = vmul.f32 %v948_v49, %v674_v54  ;;  %v681_v6 = vmul.f32 %v948_v49, %v675_v10 }
 0x283   :  { %v516_v17 = vmul.f32 0.5, %v514_v58 }
 0x284   :  { %v517_v9 = vmul.f32 %v515_v52, %v507_v51  ;;  %v682_v56 = vmul.f32 %v680_v48, %v500_v3  ;;  %v683_v59 = vmul.f32 %v681_v6, %v500_v3 }
 0x285   :  { %v518_v53 = vmul.f32 %v516_v17, %v508_v20 }
 0x286   :  { %v684_v15 = vadd.f32 %v682_v56, %v506_v40  ;;  %v685_v11 = vadd.f32 %v683_v59, %v506_v40 }
 0x287   :  { %v696_v7 = vpack.c.bf16 %v518_v53, %v517_v9 }
 0x288   :  { %v686_v1 = vmul.f32 0.5, %v684_v15  ;;  %v687_v21 = vmul.f32 0.5, %v685_v11 }
 0x289   :  { %885 = vmatprep.mubr.bf16.mxu1 %v696_v7 }
 0x28a   :  { %949 = vtanh.f32 %v686_v1 }
 0x28b   :  { %951 = vtanh.f32 %v687_v21 }
 0x294   :  { %v950_v41 = vpop.eup %949 }
 0x295   :  { %v952_v32 = vpop.eup %951  ;;  %v690_v24 = vadd.f32 1.0, %v950_v41 }
 0x296   :  { %v691_v12 = vadd.f32 1.0, %v952_v32 }
 0x297   :  { %v692_v46 = vmul.f32 0.5, %v690_v24 }
 0x298   :  { %v693_v37 = vmul.f32 0.5, %v691_v12 }
 0x299   :  { %v694_v22 = vmul.f32 %v692_v46, %v684_v15 }
 0x29a   :  { %v695_v18 = vmul.f32 %v693_v37, %v685_v11 }
 0x29c   :  { %v697_v8 = vpack.c.bf16 %v695_v18, %v694_v22 }
 0x29e   :  { %886 = vmatmul.mubr.bf16.vlgmr.msra.gmra.mrb[0].mxu1 %v697_v8 }
 0x371   :  { %v887_v28 = vpop.f32.mrb[0].mxu1 }
 0x372   :  { %v809_v25 = vadd.f32 %v887_v28, %v717_v16  ;;  %v800_v26 = vpop.f32.mrb[1].mxu1 }
 0x373   :  { %v801_v57 = vadd.f32 %v800_v26, %v717_v16  ;;  %v888_v27 = vpop.f32.mrb[2].mxu1 }
 0x374   :  { %817 = vst [vmem:[#allocation2 + $0x10] sm:$0xff] %v809_v25  ;;  %v812_v36 = vadd.f32 %v888_v27, %v717_v16  ;;  %v803_v23 = vpop.f32.mrb[3].mxu1 }
 0x375   :  { %815 = vst [vmem:[#allocation2] sm:$0xff] %v801_v57  ;;  %v804_v29 = vadd.f32 %v803_v23, %v717_v16 }
 0x376   :  { %818 = vst [vmem:[#allocation2 + $0x18] sm:$0xff] %v812_v36 }
 0x377   :  { %816 = vst [vmem:[#allocation2 + $0x8] sm:$0xff] %v804_v29 }
 0x378   :  { %964 = shalt.err (!%p961_p4)
}
 0x379   :  { %s965_s15 = scalar_lea.hbm %s1402_s7, 512 }
 0x37a   :  { %p966_p5 = scmp.ne.s32.totalorder %s1402_s7, %s965_s15  ;;  %p969_p6 = scmp.lt.u32.totalorder %s965_s15, %s1402_s7 }
 0x37c   :  { %p971_p7 = pnand %p969_p6, %p966_p5 }
 0x37e   :  { %974 = shalt.err (!%p971_p7)
}
 0x37f   :  { %s979_s3 = smov 128   ;;  %s980_s18 = smov 8  }
 0x380   :  { %830 = dma.vmem_to_hbm [thread:$0]  %s825_s12, 512, %s1402_s7, [#allocation3], %s979_s3, %s979_s3, %s980_s18  }
 0x381   :  { %975 = dma.done.wait [#allocation3], 512  }
 0x382   :  { %976 = vsyncadd [#allocation3], 4294966784 }
 0x383   :  { %834 = vsyncpa [#allocation3], 1 }

</bundles_post_ra>
